<compile_context>
chip_gen: v5e
topology: v5e:2x2
jax: 0.10.0
libtpu: 0.0.40
codegen_flags: <defaults>
</compile_context>

<pallas_src>
import functools

import jax
import jax.numpy as jnp
from jax.experimental import pallas as pl
from jax.experimental.pallas import tpu as pltpu


# ---------------------------------------------------------------------------
# hardware / tiling helpers
# ---------------------------------------------------------------------------
def _vmem_capacity_bytes():
    try:
        return int(pltpu.get_tpu_info().vmem_capacity_bytes)
    except Exception:
        return 64 * 1024 * 1024          # conservative fallback (v7x per-core)


def _pick_tile(dim, pref, align):
    """Largest tile <= pref that divides dim and is a multiple of `align`;
    falls back to the full dim (block == full array is always legal)."""
    if dim <= pref:
        return dim
    t = (pref // align) * align
    while t >= align:
        if dim % t == 0:
            return t
        t -= align
    return dim


def _lstm_vmem_bytes(Tc, Bblk, D0, H, nlayers, w_bytes, act_bytes):
    """Per-grid-step VMEM footprint estimate for the fused LSTM kernel."""
    rows = Tc * Bblk
    est = 2 * rows * D0 * 4                      # x input block (double-buffered)
    est += 2 * Bblk * Tc * H * 4                 # y output block (double-buffered)
    est += 2 * 2 * nlayers * Bblk * H * 4        # h_n / c_n output blocks
    est += rows * 4 * H * 4                      # xp_sc scratch (f32)
    est += rows * H * act_bytes                  # ybuf scratch
    for layer in range(nlayers):                 # weights resident once (VMEM space)
        din = D0 if layer == 0 else H
        est += (din + H) * 4 * H * w_bytes + 4 * H * 4
    return est


def _pick_time_chunk(T, Bblk, nb, est_fn, budget):
    """Largest divisor of T that keeps blocks (8,128)-legal and fits `budget`."""
    def legal(c):
        ok_rows = ((c * Bblk) % 8 == 0) or (nb == 1 and c == T)
        ok_tc = (c % 8 == 0) or (c == T)
        return ok_rows and ok_tc

    best = None
    for c in range(1, T + 1):
        if T % c != 0 or not legal(c):
            continue
        if est_fn(c) <= budget and (best is None or c > best):
            best = c
    if best is not None:
        return best
    for c in range(1, T + 1):                    # nothing fits: smallest legal chunk
        if T % c == 0 and legal(c):
            return c
    return T


# ---------------------------------------------------------------------------
# Fused multi-layer LSTM kernel.
# grid = (batch blocks, time chunks); recurrence runs in-kernel (fori_loop).
# ---------------------------------------------------------------------------
def _make_lstm_stack_kernel(nlayers, Bblk, H, Tc):
    row_aligned = (Bblk % 8 == 0)

    def kernel(*refs):
        x_ref = refs[0]
        w_refs = refs[1:1 + 3 * nlayers]          # (wih_T, whh_T, bias) per layer
        y_ref, hn_ref, cn_ref, xp_sc, ybuf_sc = refs[1 + 3 * nlayers:]

        chunk = pl.program_id(1)

        @pl.when(chunk == 0)
        def _init():
            hn_ref[...] = jnp.zeros_like(hn_ref)
            cn_ref[...] = jnp.zeros_like(cn_ref)

        x_cur = x_ref[...]                        # (Tc*Bblk, Din), time-major rows

        for layer in range(nlayers):              # unrolled at trace time
            wih_ref = w_refs[3 * layer + 0]
            whh_ref = w_refs[3 * layer + 1]
            bias_ref = w_refs[3 * layer + 2]
            last = (layer == nlayers - 1)

            # Hoisted input projection for the whole chunk: one MXU matmul
            # covering every timestep, with the combined (b_ih+b_hh) folded in.
            xp_sc[...] = (
                jnp.dot(x_cur.astype(wih_ref.dtype), wih_ref[...],
                        preferred_element_type=jnp.float32)
                + bias_ref[...])

            def step(t, carry, _whh_ref=whh_ref):
                h, c = carry
                row = t * Bblk
                if row_aligned:
                    row = pl.multiple_of(row, 8)
                # gates (Bblk, 4H) in reordered (i, f, o, g) column order
                gates = xp_sc[pl.ds(row, Bblk), :] + jnp.dot(
                    h.astype(_whh_ref.dtype), _whh_ref[...],
                    preferred_element_type=jnp.float32)
                sig = jax.nn.sigmoid(gates[:, :3 * H])   # contiguous 3H slab
                i_g = sig[:, 0:H]
                f_g = sig[:, H:2 * H]
                o_g = sig[:, 2 * H:3 * H]
                g_g = jnp.tanh(gates[:, 3 * H:])         # contiguous H slab
                c_new = f_g * c + i_g * g_g
                h_new = o_g * jnp.tanh(c_new)
                ybuf_sc[pl.ds(row, Bblk), :] = h_new.astype(ybuf_sc.dtype)
                return h_new, c_new

            if Tc <= 16:
                unroll = True
            elif Tc % 4 == 0:
                unroll = 4
            elif Tc % 2 == 0:
                unroll = 2
            else:
                unroll = 1
            h_f, c_f = jax.lax.fori_loop(
                0, Tc, step, (hn_ref[layer], cn_ref[layer]), unroll=unroll)
            hn_ref[layer] = h_f
            cn_ref[layer] = c_f

            if last:
                # Fused (Tc,Bblk,H)->(Bblk,Tc,H) relayout: batch-first output
                # leaves the kernel directly (no XLA transpose / HBM round trip).
                for j in range(Bblk):
                    y_ref[j] = ybuf_sc[pl.ds(j, Tc, stride=Bblk), :].astype(
                        y_ref.dtype)
            else:
                x_cur = ybuf_sc[...]              # next layer's input, stays in VMEM

    return kernel


def lstm_stack(x_rows, kparams, *, nlayers, B, T, nb, time_chunk=None):
    """x_rows: (nb*T*Bblk, ninp) f32 rows ordered [batch_block][time][batch].
    Returns (y (B,T,nhid) batch-first, h_n (nlayers,B,nhid), c_n (...))."""
    Bblk = B // nb
    _, D0 = x_rows.shape
    H = kparams["whh_T_l0"].shape[0]
    w_dtype = kparams["wih_T_l0"].dtype
    w_bytes = jnp.dtype(w_dtype).itemsize
    act_bytes = w_bytes

    cap = _vmem_capacity_bytes()
    budget = (cap * 3) // 5
    est_fn = lambda c: _lstm_vmem_bytes(c, Bblk, D0, H, nlayers, w_bytes, act_bytes)
    if time_chunk is None:
        Tc = _pick_time_chunk(T, Bblk, nb, est_fn, budget)
    else:
        Tc = int(time_chunk)
        assert T % Tc == 0, "time_chunk must divide T"
    num_chunks = T // Tc
    est = est_fn(Tc)
    vmem_limit = int(min(cap - (4 << 20),
                         max(est + est // 4 + (4 << 20), 32 << 20)))

    # inputs: x (blocked over batch-block x time-chunk), weights resident in VMEM
    in_specs = [pl.BlockSpec((Tc * Bblk, D0),
                             lambda b, c: (b * num_chunks + c, 0))]
    args = [x_rows]
    wspec = pl.BlockSpec(memory_space=pltpu.MemorySpace.VMEM)  # no double-buffer
    for layer in range(nlayers):
        in_specs += [wspec, wspec, wspec]
        args += [kparams[f"wih_T_l{layer}"], kparams[f"whh_T_l{layer}"],
                 kparams[f"bias_l{layer}"]]

    out_shapes = (jax.ShapeDtypeStruct((B, T, H), jnp.float32),
                  jax.ShapeDtypeStruct((nlayers, B, H), jnp.float32),
                  jax.ShapeDtypeStruct((nlayers, B, H), jnp.float32))
    out_specs = (pl.BlockSpec((Bblk, Tc, H), lambda b, c: (b, c, 0)),
                 pl.BlockSpec((nlayers, Bblk, H), lambda b, c: (0, b, 0)),
                 pl.BlockSpec((nlayers, Bblk, H), lambda b, c: (0, b, 0)))

    kernel = _make_lstm_stack_kernel(nlayers, Bblk, H, Tc)
    return pl.pallas_call(
        kernel,
        out_shape=out_shapes,
        grid_spec=pltpu.PrefetchScalarGridSpec(
            num_scalar_prefetch=0,
            grid=(nb, num_chunks),
            in_specs=in_specs,
            out_specs=out_specs,
            scratch_shapes=[pltpu.VMEM((Tc * Bblk, 4 * H), jnp.float32),  # x-proj
                            pltpu.VMEM((Tc * Bblk, H), w_dtype)]),       # layer out
        compiler_params=pltpu.CompilerParams(
            # batch blocks are independent (megacore on v7x); time is sequential
            dimension_semantics=("parallel", "arbitrary"),
            vmem_limit_bytes=vmem_limit),
    )(*args)


# ---------------------------------------------------------------------------
# Generic tiled linear kernel (decoder_1 and decoder_2):
# grid = (row tiles, col tiles, K tiles) with a VMEM f32 accumulator.
# ---------------------------------------------------------------------------
def _linear_kernel(x_ref, w_ref, b_ref, out_ref, acc_ref):
    k = pl.program_id(2)

    @pl.when(k == 0)
    def _zero():
        acc_ref[...] = jnp.zeros_like(acc_ref)

    acc_ref[...] += jnp.dot(x_ref[...].astype(w_ref.dtype), w_ref[...],
                            preferred_element_type=jnp.float32)

    @pl.when(k == pl.num_programs(2) - 1)
    def _finalize():
        out_ref[...] = (acc_ref[...] + b_ref[...]).astype(out_ref.dtype)


def linear(x, w_t, b, *, out_dtype=jnp.float32,
           tile_m=512, tile_n=1024, tile_k=1024):
    """y = x @ w_t + b  (PyTorch Linear with w_t = W.T pre-transposed).
    x: (N, K), w_t: (K, M), b: (1, M)."""
    N, K = x.shape
    _, M = w_t.shape
    tm = _pick_tile(N, tile_m, 8)       # row tile, sublane aligned
    tn = _pick_tile(M, tile_n, 128)     # lane-dense (128-multiple) output tile
    tk = _pick_tile(K, tile_k, 128)
    grid = (N // tm, M // tn, K // tk)

    cap = _vmem_capacity_bytes()
    xb = jnp.dtype(x.dtype).itemsize
    wb = jnp.dtype(w_t.dtype).itemsize
    ob = jnp.dtype(out_dtype).itemsize
    est = (2 * (tm * tk * xb + tk * tn * wb + tn * 4)
           + 2 * tm * tn * ob + tm * tn * 4)
    vmem_limit = int(min(cap - (4 << 20), max(est + (16 << 20), 32 << 20)))

    return pl.pallas_call(
        _linear_kernel,
        out_shape=jax.ShapeDtypeStruct((N, M), out_dtype),
        grid_spec=pltpu.PrefetchScalarGridSpec(
            num_scalar_prefetch=0,
            grid=grid,
            in_specs=[
                pl.BlockSpec((tm, tk), lambda i, j, k: (i, k)),
                pl.BlockSpec((tk, tn), lambda i, j, k: (k, j)),
                pl.BlockSpec((1, tn), lambda i, j, k: (0, j)),
            ],
            out_specs=pl.BlockSpec((tm, tn), lambda i, j, k: (i, j)),
            scratch_shapes=[pltpu.VMEM((tm, tn), jnp.float32)],
        ),
        compiler_params=pltpu.CompilerParams(
            dimension_semantics=("parallel", "parallel", "arbitrary"),
            vmem_limit_bytes=vmem_limit),
    )(x, w_t, b)


# ---------------------------------------------------------------------------
# One-time weight preparation (transpose / gate reorder / bias combine / cast)
# ---------------------------------------------------------------------------
def prepare_params(raw, nlayers, weights_dtype=jnp.float32):
    kp = {"encoder_weight": raw["encoder_weight"].astype(jnp.float32)}
    H = raw["w_hh_l0"].shape[1]
    # PyTorch gate order is (i, f, g, o); reorder columns to (i, f, o, g) so
    # sigmoid acts on one contiguous 3H slab and tanh on the trailing H slab.
    perm = jnp.concatenate([jnp.arange(0, 2 * H),        # i, f
                            jnp.arange(3 * H, 4 * H),    # o
                            jnp.arange(2 * H, 3 * H)])   # g
    for layer in range(nlayers):
        wih_t = jnp.transpose(raw[f"w_ih_l{layer}"])[:, perm]
        whh_t = jnp.transpose(raw[f"w_hh_l{layer}"])[:, perm]
        bias = (raw[f"b_ih_l{layer}"] + raw[f"b_hh_l{layer}"])[perm]
        kp[f"wih_T_l{layer}"] = wih_t.astype(weights_dtype)
        kp[f"whh_T_l{layer}"] = whh_t.astype(weights_dtype)
        kp[f"bias_l{layer}"] = bias.reshape(1, 4 * H).astype(jnp.float32)
    kp["dec1_wT"] = jnp.transpose(raw["dec1_w"]).astype(weights_dtype)
    kp["dec1_b"] = raw["dec1_b"].reshape(1, -1).astype(jnp.float32)
    kp["dec2_wT"] = jnp.transpose(raw["dec2_w"]).astype(weights_dtype)
    kp["dec2_b"] = raw["dec2_b"].reshape(1, -1).astype(jnp.float32)
    return kp


# ---------------------------------------------------------------------------
# Full forward (default branch: GAE_embedding=None, labels=None, target=None)
# ---------------------------------------------------------------------------
def code_gpt_forward(kparams, input_ids, *, nlayers, batch_splits=None,
                     time_chunk=None):
    # Dropout(p=0.5) is the eval-mode identity.
    B, T = input_ids.shape
    nb = batch_splits
    if nb is None:
        nb = 2 if (B % 16 == 0) else 1    # batch split across v7x's 2 TCs
    if B % nb != 0 or (nb > 1 and (B // nb) % 8 != 0):
        nb = 1
    Bblk = B // nb

    # Reorder only the tiny int ids to [batch_block][time][batch_in_block] and
    # gather embeddings directly in that order (no activation transpose).
    # TODO(synk): the embedding gather could be fused into the LSTM kernel via
    # scalar-prefetched ids to save one HBM round trip of the (T*B, ninp) slab.
    ids = input_ids.reshape(nb, Bblk, T).transpose(0, 2, 1).reshape(-1)
    x_rows = jnp.take(kparams["encoder_weight"], ids, axis=0)   # (nb*T*Bblk, ninp)

    y, h_n, c_n = lstm_stack(x_rows, kparams, nlayers=nlayers, B=B, T=T,
                             nb=nb, time_chunk=time_chunk)

    H = y.shape[-1]
    out2d = y.reshape(B * T, H)                   # batch-first rows, free reshape

    wdt = kparams["dec1_wT"].dtype
    hid = linear(out2d, kparams["dec1_wT"], kparams["dec1_b"],
                 out_dtype=wdt, tile_m=512)                       # decoder_1
    logits = linear(hid, kparams["dec2_wT"], kparams["dec2_b"],
                    out_dtype=jnp.float32, tile_m=1024)           # decoder_2
    ntok = logits.shape[-1]
    return logits.reshape(B, T, ntok), (h_n, c_n)
    # TODO(synk): GAE_input LSTM branch and labels/target cross-entropy paths
    # are not on the default forward path and are not implemented here.


# ---------------------------------------------------------------------------
# Deterministic raw (PyTorch-layout) parameters
# ---------------------------------------------------------------------------
def init_params(key, ntoken, ninp, nhid, nlayers):
    params = {"nlayers": nlayers}
    initrange = 0.1
    n1 = int(ntoken / 3)
    keys = iter(jax.random.split(key, 4 + 4 * nlayers + 2))

    params["encoder_weight"] = jax.random.uniform(
        next(keys), (ntoken, ninp), jnp.float32, -initrange, initrange)

    stdv = 1.0 / (nhid ** 0.5)
    for layer in range(nlayers):
        in_dim = ninp if layer == 0 else nhid
        params[f"w_ih_l{layer}"] = jax.random.uniform(
            next(keys), (4 * nhid, in_dim), jnp.float32, -stdv, stdv)
        params[f"w_hh_l{layer}"] = jax.random.uniform(
            next(keys), (4 * nhid, nhid), jnp.float32, -stdv, stdv)
        params[f"b_ih_l{layer}"] = jax.random.uniform(
            next(keys), (4 * nhid,), jnp.float32, -stdv, stdv)
        params[f"b_hh_l{layer}"] = jax.random.uniform(
            next(keys), (4 * nhid,), jnp.float32, -stdv, stdv)

    params["dec1_w"] = jax.random.uniform(
        next(keys), (n1, nhid), jnp.float32, -initrange, initrange)
    params["dec1_b"] = jax.random.uniform(
        next(keys), (n1,), jnp.float32, -1.0 / (nhid ** 0.5), 1.0 / (nhid ** 0.5))
    params["dec2_w"] = jax.random.uniform(
        next(keys), (ntoken, n1), jnp.float32, -initrange, initrange)
    params["dec2_b"] = jax.random.uniform(
        next(keys), (ntoken,), jnp.float32, -1.0 / (n1 ** 0.5), 1.0 / (n1 ** 0.5))
    return params


# ---------------------------------------------------------------------------
# Pure-JAX reference (PyTorch semantics) for correctness checks
# ---------------------------------------------------------------------------
def _lstm_ref(x_tbd, w_ih, w_hh, b_ih, b_hh):
    _, B, _ = x_tbd.shape
    H = w_hh.shape[1]

    def step(carry, xt):
        h, c = carry
        gates = xt @ w_ih.T + b_ih + h @ w_hh.T + b_hh
        i, f, g, o = jnp.split(gates, 4, axis=-1)
        c = jax.nn.sigmoid(f) * c + jax.nn.sigmoid(i) * jnp.tanh(g)
        h = jax.nn.sigmoid(o) * jnp.tanh(c)
        return (h, c), h

    (h, c), ys = jax.lax.scan(
        step, (jnp.zeros((B, H), jnp.float32), jnp.zeros((B, H), jnp.float32)),
        x_tbd)
    return ys, h, c


def _forward_ref(params, input_ids):
    emb = params["encoder_weight"][input_ids]
    B, T, _ = emb.shape
    x = jnp.transpose(emb, (1, 0, 2))
    hs, cs = [], []
    for layer in range(params["nlayers"]):
        x, h_l, c_l = _lstm_ref(x, params[f"w_ih_l{layer}"], params[f"w_hh_l{layer}"],
                                params[f"b_ih_l{layer}"], params[f"b_hh_l{layer}"])
        hs.append(h_l)
        cs.append(c_l)
    out = jnp.transpose(x, (1, 0, 2))
    out = out @ params["dec1_w"].T + params["dec1_b"]
    out = out @ params["dec2_w"].T + params["dec2_b"]
    return out, (jnp.stack(hs, 0), jnp.stack(cs, 0))


if __name__ == "__main__":
    # ---------------- tiny config (single batch block, single chunk) --------
    ntoken, ninp, nhid, nlayers = 30, 16, 32, 2
    B, T = 2, 8

    key = jax.random.PRNGKey(0)
    pkey, ikey = jax.random.split(key)
    raw = init_params(pkey, ntoken, ninp, nhid, nlayers)
    input_ids = jax.random.randint(ikey, (B, T), 0, ntoken, dtype=jnp.int32)

    ref_logits, (ref_h, ref_c) = _forward_ref(raw, input_ids)
    fwd = jax.jit(functools.partial(code_gpt_forward, nlayers=nlayers))

    # f32 weights: tight check against the pure-JAX reference.
    kp32 = prepare_params(raw, nlayers, weights_dtype=jnp.float32)
    logits, (h_n, c_n) = fwd(kp32, input_ids)
    jax.block_until_ready((logits, h_n, c_n))
    assert logits.shape == (B, T, ntoken)
    assert h_n.shape == (nlayers, B, nhid) and c_n.shape == (nlayers, B, nhid)
    assert jnp.max(jnp.abs(logits - ref_logits)) < 5e-3
    assert jnp.max(jnp.abs(h_n - ref_h)) < 5e-3
    assert jnp.max(jnp.abs(c_n - ref_c)) < 5e-3

    # bf16 weight matrices (MXU-friendly, f32 accumulation): looser check.
    kp16 = prepare_params(raw, nlayers, weights_dtype=jnp.bfloat16)
    logits16, (h16, c16) = fwd(kp16, input_ids)
    jax.block_until_ready((logits16, h16, c16))
    assert jnp.max(jnp.abs(logits16 - ref_logits)) < 5e-2
    assert jnp.max(jnp.abs(h16 - ref_h)) < 5e-2
    assert jnp.max(jnp.abs(c16 - ref_c)) < 5e-2

    # ---------------- medium config: exercises the parallel batch-split axis,
    # multi-chunk recurrence carry and the in-kernel batch-first relayout ----
    ntoken2, ninp2, nhid2, nlayers2 = 48, 32, 64, 2
    B2, T2 = 16, 24
    k2, k3 = jax.random.split(jax.random.PRNGKey(1))
    raw2 = init_params(k2, ntoken2, ninp2, nhid2, nlayers2)
    ids2 = jax.random.randint(k3, (B2, T2), 0, ntoken2, dtype=jnp.int32)

    ref2_logits, (ref2_h, ref2_c) = _forward_ref(raw2, ids2)
    fwd2 = jax.jit(functools.partial(code_gpt_forward, nlayers=nlayers2,
                                     time_chunk=8))
    kp2 = prepare_params(raw2, nlayers2, weights_dtype=jnp.float32)
    l2, (h2, c2) = fwd2(kp2, ids2)
    jax.block_until_ready((l2, h2, c2))
    assert l2.shape == (B2, T2, ntoken2)
    assert h2.shape == (nlayers2, B2, nhid2) and c2.shape == (nlayers2, B2, nhid2)
    assert jnp.max(jnp.abs(l2 - ref2_logits)) < 1e-2
    assert jnp.max(jnp.abs(h2 - ref2_h)) < 1e-2
    assert jnp.max(jnp.abs(c2 - ref2_c)) < 1e-2

    print("KERNEL_OK")
</pallas_src>

<mosaic_0001>
module attributes {stable_mosaic.version = 11 : i64} {
  func.func @_linear_kernel(%arg0: i32, %arg1: i32, %arg2: i32, %arg3: memref<16x10xf32, #tpu.memory_space<vmem>>, %arg4: memref<10x30xf32, #tpu.memory_space<vmem>>, %arg5: memref<1x30xf32, #tpu.memory_space<vmem>>, %arg6: memref<16x30xf32, #tpu.memory_space<vmem>>, %arg7: memref<16x30xf32, #tpu.memory_space<vmem>>) attributes {dimension_semantics = [#tpu.dimension_semantics<parallel>, #tpu.dimension_semantics<parallel>, #tpu.dimension_semantics<arbitrary>], iteration_bounds = array<i64: 1, 1, 1>, scalar_prefetch = 0 : i64, scratch_operands = 1 : i64, tpu.core_type = #tpu.core_type<tc>, window_params = [{transform_indices = @transform_0, window_bounds = array<i64: 16, 10>}, {transform_indices = @transform_1, window_bounds = array<i64: 10, 30>}, {transform_indices = @transform_2, window_bounds = array<i64: 1, 30>}, {transform_indices = @transform_3, window_bounds = array<i64: 16, 30>}]} {
    %c0_i32 = arith.constant 0 : i32
    %0 = arith.cmpi eq, %arg2, %c0_i32 : i32
    %1 = arith.extui %0 : i1 to i32
    %c0_i32_0 = arith.constant 0 : i32
    %2 = arith.cmpi ne, %1, %c0_i32_0 : i32
    scf.if %2 {
      %cst_10 = arith.constant 0.000000e+00 : f32
      %12 = vector.broadcast %cst_10 : f32 to vector<16x30xf32>
      %c0_11 = arith.constant 0 : index
      %c0_12 = arith.constant 0 : index
      %13 = vector.load %arg7[%c0_11, %c0_12] : memref<16x30xf32, #tpu.memory_space<vmem>>, vector<16x30xf32>
      tpu.vector_store %arg7[%c0_11, %c0_12], %12 {strides = array<i32>} : memref<16x30xf32, #tpu.memory_space<vmem>>, vector<16x30xf32>,
    } else {
    }
    %c0 = arith.constant 0 : index
    %c0_1 = arith.constant 0 : index
    %3 = vector.load %arg7[%c0, %c0_1] : memref<16x30xf32, #tpu.memory_space<vmem>>, vector<16x30xf32>
    %c0_2 = arith.constant 0 : index
    %c0_3 = arith.constant 0 : index
    %4 = vector.load %arg3[%c0_2, %c0_3] : memref<16x10xf32, #tpu.memory_space<vmem>>, vector<16x10xf32>
    %c0_4 = arith.constant 0 : index
    %c0_5 = arith.constant 0 : index
    %5 = vector.load %arg4[%c0_4, %c0_5] : memref<10x30xf32, #tpu.memory_space<vmem>>, vector<10x30xf32>
    %cst = arith.constant dense<0.000000e+00> : vector<16x30xf32>
    %6 = tpu.matmul %4, %5, %cst {dimension_numbers = #tpu.dot_dimension_numbers<[1], [0], [0], [1], [0, 0, 1, 1], [], []>} : vector<16x10xf32>, vector<10x30xf32>, vector<16x30xf32> -> vector<16x30xf32>
    %7 = arith.addf %3, %6 : vector<16x30xf32>
    %c0_6 = arith.constant 0 : index
    %c0_7 = arith.constant 0 : index
    %8 = vector.load %arg7[%c0_6, %c0_7] : memref<16x30xf32, #tpu.memory_space<vmem>>, vector<16x30xf32>
    tpu.vector_store %arg7[%c0_6, %c0_7], %7 {strides = array<i32>} : memref<16x30xf32, #tpu.memory_space<vmem>>, vector<16x30xf32>,
    %c0_i32_8 = arith.constant 0 : i32
    %9 = arith.cmpi eq, %arg2, %c0_i32_8 : i32
    %10 = arith.extui %9 : i1 to i32
    %c0_i32_9 = arith.constant 0 : i32
    %11 = arith.cmpi ne, %10, %c0_i32_9 : i32
    scf.if %11 {
      %c0_10 = arith.constant 0 : index
      %c0_11 = arith.constant 0 : index
      %12 = vector.load %arg7[%c0_10, %c0_11] : memref<16x30xf32, #tpu.memory_space<vmem>>, vector<16x30xf32>
      %c0_12 = arith.constant 0 : index
      %c0_13 = arith.constant 0 : index
      %13 = vector.load %arg5[%c0_12, %c0_13] : memref<1x30xf32, #tpu.memory_space<vmem>>, vector<1x30xf32>
      %14 = vector.broadcast %13 : vector<1x30xf32> to vector<16x30xf32>
      %15 = arith.addf %12, %14 : vector<16x30xf32>
      %c0_14 = arith.constant 0 : index
      %c0_15 = arith.constant 0 : index
      %16 = vector.load %arg6[%c0_14, %c0_15] : memref<16x30xf32, #tpu.memory_space<vmem>>, vector<16x30xf32>
      tpu.vector_store %arg6[%c0_14, %c0_15], %15 {strides = array<i32>} : memref<16x30xf32, #tpu.memory_space<vmem>>, vector<16x30xf32>,
    } else {
    }
    return
  }
  func.func @transform_0(%arg0: i32, %arg1: i32, %arg2: i32) -> (i32, i32) {
    %c0_i32 = arith.constant 0 : i32
    return %arg0, %arg2 : i32, i32
  }
  func.func @transform_1(%arg0: i32, %arg1: i32, %arg2: i32) -> (i32, i32) {
    %c0_i32 = arith.constant 0 : i32
    return %arg2, %arg1 : i32, i32
  }
  func.func @transform_2(%arg0: i32, %arg1: i32, %arg2: i32) -> (i32, i32) {
    %c0_i32 = arith.constant 0 : i32
    %c0_i32_0 = arith.constant 0 : i32
    return %c0_i32, %arg1 : i32, i32
  }
  func.func @transform_3(%arg0: i32, %arg1: i32, %arg2: i32) -> (i32, i32) {
    %c0_i32 = arith.constant 0 : i32
    return %arg0, %arg1 : i32, i32
  }
}

module attributes {stable_mosaic.version = 11 : i64} {
  func.func @_linear_kernel(%arg0: i32, %arg1: i32, %arg2: i32, %arg3: memref<16x32xf32, #tpu.memory_space<vmem>>, %arg4: memref<32x10xf32, #tpu.memory_space<vmem>>, %arg5: memref<1x10xf32, #tpu.memory_space<vmem>>, %arg6: memref<16x10xf32, #tpu.memory_space<vmem>>, %arg7: memref<16x10xf32, #tpu.memory_space<vmem>>) attributes {dimension_semantics = [#tpu.dimension_semantics<parallel>, #tpu.dimension_semantics<parallel>, #tpu.dimension_semantics<arbitrary>], iteration_bounds = array<i64: 1, 1, 1>, scalar_prefetch = 0 : i64, scratch_operands = 1 : i64, tpu.core_type = #tpu.core_type<tc>, window_params = [{transform_indices = @transform_0, window_bounds = array<i64: 16, 32>}, {transform_indices = @transform_1, window_bounds = array<i64: 32, 10>}, {transform_indices = @transform_2, window_bounds = array<i64: 1, 10>}, {transform_indices = @transform_3, window_bounds = array<i64: 16, 10>}]} {
    %c0_i32 = arith.constant 0 : i32
    %0 = arith.cmpi eq, %arg2, %c0_i32 : i32
    %1 = arith.extui %0 : i1 to i32
    %c0_i32_0 = arith.constant 0 : i32
    %2 = arith.cmpi ne, %1, %c0_i32_0 : i32
    scf.if %2 {
      %cst_10 = arith.constant 0.000000e+00 : f32
      %12 = vector.broadcast %cst_10 : f32 to vector<16x10xf32>
      %c0_11 = arith.constant 0 : index
      %c0_12 = arith.constant 0 : index
      %13 = vector.load %arg7[%c0_11, %c0_12] : memref<16x10xf32, #tpu.memory_space<vmem>>, vector<16x10xf32>
      tpu.vector_store %arg7[%c0_11, %c0_12], %12 {strides = array<i32>} : memref<16x10xf32, #tpu.memory_space<vmem>>, vector<16x10xf32>,
    } else {
    }
    %c0 = arith.constant 0 : index
    %c0_1 = arith.constant 0 : index
    %3 = vector.load %arg7[%c0, %c0_1] : memref<16x10xf32, #tpu.memory_space<vmem>>, vector<16x10xf32>
    %c0_2 = arith.constant 0 : index
    %c0_3 = arith.constant 0 : index
    %4 = vector.load %arg3[%c0_2, %c0_3] : memref<16x32xf32, #tpu.memory_space<vmem>>, vector<16x32xf32>
    %c0_4 = arith.constant 0 : index
    %c0_5 = arith.constant 0 : index
    %5 = vector.load %arg4[%c0_4, %c0_5] : memref<32x10xf32, #tpu.memory_space<vmem>>, vector<32x10xf32>
    %cst = arith.constant dense<0.000000e+00> : vector<16x10xf32>
    %6 = tpu.matmul %4, %5, %cst {dimension_numbers = #tpu.dot_dimension_numbers<[1], [0], [0], [1], [0, 0, 1, 1], [], []>} : vector<16x32xf32>, vector<32x10xf32>, vector<16x10xf32> -> vector<16x10xf32>
    %7 = arith.addf %3, %6 : vector<16x10xf32>
    %c0_6 = arith.constant 0 : index
    %c0_7 = arith.constant 0 : index
    %8 = vector.load %arg7[%c0_6, %c0_7] : memref<16x10xf32, #tpu.memory_space<vmem>>, vector<16x10xf32>
    tpu.vector_store %arg7[%c0_6, %c0_7], %7 {strides = array<i32>} : memref<16x10xf32, #tpu.memory_space<vmem>>, vector<16x10xf32>,
    %c0_i32_8 = arith.constant 0 : i32
    %9 = arith.cmpi eq, %arg2, %c0_i32_8 : i32
    %10 = arith.extui %9 : i1 to i32
    %c0_i32_9 = arith.constant 0 : i32
    %11 = arith.cmpi ne, %10, %c0_i32_9 : i32
    scf.if %11 {
      %c0_10 = arith.constant 0 : index
      %c0_11 = arith.constant 0 : index
      %12 = vector.load %arg7[%c0_10, %c0_11] : memref<16x10xf32, #tpu.memory_space<vmem>>, vector<16x10xf32>
      %c0_12 = arith.constant 0 : index
      %c0_13 = arith.constant 0 : index
      %13 = vector.load %arg5[%c0_12, %c0_13] : memref<1x10xf32, #tpu.memory_space<vmem>>, vector<1x10xf32>
      %14 = vector.broadcast %13 : vector<1x10xf32> to vector<16x10xf32>
      %15 = arith.addf %12, %14 : vector<16x10xf32>
      %c0_14 = arith.constant 0 : index
      %c0_15 = arith.constant 0 : index
      %16 = vector.load %arg6[%c0_14, %c0_15] : memref<16x10xf32, #tpu.memory_space<vmem>>, vector<16x10xf32>
      tpu.vector_store %arg6[%c0_14, %c0_15], %15 {strides = array<i32>} : memref<16x10xf32, #tpu.memory_space<vmem>>, vector<16x10xf32>,
    } else {
    }
    return
  }
  func.func @transform_0(%arg0: i32, %arg1: i32, %arg2: i32) -> (i32, i32) {
    %c0_i32 = arith.constant 0 : i32
    return %arg0, %arg2 : i32, i32
  }
  func.func @transform_1(%arg0: i32, %arg1: i32, %arg2: i32) -> (i32, i32) {
    %c0_i32 = arith.constant 0 : i32
    return %arg2, %arg1 : i32, i32
  }
  func.func @transform_2(%arg0: i32, %arg1: i32, %arg2: i32) -> (i32, i32) {
    %c0_i32 = arith.constant 0 : i32
    %c0_i32_0 = arith.constant 0 : i32
    return %c0_i32, %arg1 : i32, i32
  }
  func.func @transform_3(%arg0: i32, %arg1: i32, %arg2: i32) -> (i32, i32) {
    %c0_i32 = arith.constant 0 : i32
    return %arg0, %arg1 : i32, i32
  }
}

module attributes {stable_mosaic.version = 11 : i64} {
  func.func @kernel(%arg0: i32, %arg1: i32, %arg2: memref<16x16xf32, #tpu.memory_space<vmem>>, %arg3: memref<16x128xf32, #tpu.memory_space<vmem>>, %arg4: memref<32x128xf32, #tpu.memory_space<vmem>>, %arg5: memref<1x128xf32, #tpu.memory_space<vmem>>, %arg6: memref<32x128xf32, #tpu.memory_space<vmem>>, %arg7: memref<32x128xf32, #tpu.memory_space<vmem>>, %arg8: memref<1x128xf32, #tpu.memory_space<vmem>>, %arg9: memref<2x8x32xf32, #tpu.memory_space<vmem>>, %arg10: memref<2x2x32xf32, #tpu.memory_space<vmem>>, %arg11: memref<2x2x32xf32, #tpu.memory_space<vmem>>, %arg12: memref<16x128xf32, #tpu.memory_space<vmem>>, %arg13: memref<16x32xf32, #tpu.memory_space<vmem>>) attributes {dimension_semantics = [#tpu.dimension_semantics<parallel>, #tpu.dimension_semantics<arbitrary>], iteration_bounds = array<i64: 1, 1>, scalar_prefetch = 0 : i64, scratch_operands = 2 : i64, tpu.core_type = #tpu.core_type<tc>, window_params = [{transform_indices = @transform_0, window_bounds = array<i64: 16, 16>}, {pipeline_mode = #tpu.pipeline_mode<synchronous>, transform_indices = @transform_1, window_bounds = array<i64: 16, 128>}, {pipeline_mode = #tpu.pipeline_mode<synchronous>, transform_indices = @transform_2, window_bounds = array<i64: 32, 128>}, {pipeline_mode = #tpu.pipeline_mode<synchronous>, transform_indices = @transform_3, window_bounds = array<i64: 1, 128>}, {pipeline_mode = #tpu.pipeline_mode<synchronous>, transform_indices = @transform_4, window_bounds = array<i64: 32, 128>}, {pipeline_mode = #tpu.pipeline_mode<synchronous>, transform_indices = @transform_5, window_bounds = array<i64: 32, 128>}, {pipeline_mode = #tpu.pipeline_mode<synchronous>, transform_indices = @transform_6, window_bounds = array<i64: 1, 128>}, {transform_indices = @transform_7, window_bounds = array<i64: 2, 8, 32>}, {transform_indices = @transform_8, window_bounds = array<i64: 2, 2, 32>}, {transform_indices = @transform_9, window_bounds = array<i64: 2, 2, 32>}]} {
    %c0_i32 = arith.constant 0 : i32
    %0 = arith.cmpi eq, %arg1, %c0_i32 : i32
    %1 = arith.extui %0 : i1 to i32
    %c0_i32_0 = arith.constant 0 : i32
    %2 = arith.cmpi ne, %1, %c0_i32_0 : i32
    scf.if %2 {
      %cst_172 = arith.constant 0.000000e+00 : f32
      %429 = vector.broadcast %cst_172 : f32 to vector<2x2x32xf32>
      %c0_173 = arith.constant 0 : index
      %c0_174 = arith.constant 0 : index
      %c0_175 = arith.constant 0 : index
      %430 = vector.load %arg10[%c0_173, %c0_174, %c0_175] : memref<2x2x32xf32, #tpu.memory_space<vmem>>, vector<2x2x32xf32>
      tpu.vector_store %arg10[%c0_173, %c0_174, %c0_175], %429 {strides = array<i32>} : memref<2x2x32xf32, #tpu.memory_space<vmem>>, vector<2x2x32xf32>,
      %cst_176 = arith.constant 0.000000e+00 : f32
      %431 = vector.broadcast %cst_176 : f32 to vector<2x2x32xf32>
      %c0_177 = arith.constant 0 : index
      %c0_178 = arith.constant 0 : index
      %c0_179 = arith.constant 0 : index
      %432 = vector.load %arg11[%c0_177, %c0_178, %c0_179] : memref<2x2x32xf32, #tpu.memory_space<vmem>>, vector<2x2x32xf32>
      tpu.vector_store %arg11[%c0_177, %c0_178, %c0_179], %431 {strides = array<i32>} : memref<2x2x32xf32, #tpu.memory_space<vmem>>, vector<2x2x32xf32>,
    } else {
    }
    %c0 = arith.constant 0 : index
    %c0_1 = arith.constant 0 : index
    %3 = vector.load %arg2[%c0, %c0_1] : memref<16x16xf32, #tpu.memory_space<vmem>>, vector<16x16xf32>
    %c0_2 = arith.constant 0 : index
    %c0_3 = arith.constant 0 : index
    %4 = vector.load %arg3[%c0_2, %c0_3] : memref<16x128xf32, #tpu.memory_space<vmem>>, vector<16x128xf32>
    %cst = arith.constant dense<0.000000e+00> : vector<16x128xf32>
    %5 = tpu.matmul %3, %4, %cst {dimension_numbers = #tpu.dot_dimension_numbers<[1], [0], [0], [1], [0, 0, 1, 1], [], []>} : vector<16x16xf32>, vector<16x128xf32>, vector<16x128xf32> -> vector<16x128xf32>
    %c0_4 = arith.constant 0 : index
    %c0_5 = arith.constant 0 : index
    %6 = vector.load %arg5[%c0_4, %c0_5] : memref<1x128xf32, #tpu.memory_space<vmem>>, vector<1x128xf32>
    %7 = vector.broadcast %6 : vector<1x128xf32> to vector<16x128xf32>
    %8 = arith.addf %5, %7 : vector<16x128xf32>
    %c0_6 = arith.constant 0 : index
    %c0_7 = arith.constant 0 : index
    %9 = vector.load %arg12[%c0_6, %c0_7] : memref<16x128xf32, #tpu.memory_space<vmem>>, vector<16x128xf32>
    tpu.vector_store %arg12[%c0_6, %c0_7], %8 {strides = array<i32>} : memref<16x128xf32, #tpu.memory_space<vmem>>, vector<16x128xf32>,
    %c0_8 = arith.constant 0 : index
    %c0_9 = arith.constant 0 : index
    %c0_10 = arith.constant 0 : index
    %10 = vector.load %arg10[%c0_8, %c0_9, %c0_10] : memref<2x2x32xf32, #tpu.memory_space<vmem>>, vector<1x2x32xf32>
    %11 = vector.shape_cast %10 : vector<1x2x32xf32> to vector<2x32xf32>
    %c0_11 = arith.constant 0 : index
    %c0_12 = arith.constant 0 : index
    %c0_13 = arith.constant 0 : index
    %12 = vector.load %arg11[%c0_11, %c0_12, %c0_13] : memref<2x2x32xf32, #tpu.memory_space<vmem>>, vector<1x2x32xf32>
    %13 = vector.shape_cast %12 : vector<1x2x32xf32> to vector<2x32xf32>
    %c0_i32_14 = arith.constant 0 : i32
    %c2_i32 = arith.constant 2 : i32
    %14 = arith.muli %c0_i32_14, %c2_i32 : i32
    %15 = arith.index_cast %14 : i32 to index
    %c0_15 = arith.constant 0 : index
    %16 = vector.load %arg12[%15, %c0_15] : memref<16x128xf32, #tpu.memory_space<vmem>>, vector<2x128xf32>
    %c0_16 = arith.constant 0 : index
    %c0_17 = arith.constant 0 : index
    %17 = vector.load %arg4[%c0_16, %c0_17] : memref<32x128xf32, #tpu.memory_space<vmem>>, vector<32x128xf32>
    %cst_18 = arith.constant dense<0.000000e+00> : vector<2x128xf32>
    %18 = tpu.matmul %11, %17, %cst_18 {dimension_numbers = #tpu.dot_dimension_numbers<[1], [0], [0], [1], [0, 0, 1, 1], [], []>} : vector<2x32xf32>, vector<32x128xf32>, vector<2x128xf32> -> vector<2x128xf32>
    %19 = arith.addf %16, %18 : vector<2x128xf32>
    %20 = vector.extract_strided_slice %19 {offsets = [0, 0], sizes = [2, 96], strides = [1, 1]} : vector<2x128xf32> to vector<2x96xf32>
    %21 = arith.negf %20 : vector<2x96xf32>
    %22 = math.exp %21 : vector<2x96xf32>
    %cst_19 = arith.constant 1.000000e+00 : f32
    %23 = vector.broadcast %cst_19 : f32 to vector<2x96xf32>
    %24 = arith.addf %23, %22 : vector<2x96xf32>
    %25 = arith.divf %23, %24 : vector<2x96xf32>
    %26 = vector.extract_strided_slice %25 {offsets = [0, 0], sizes = [2, 32], strides = [1, 1]} : vector<2x96xf32> to vector<2x32xf32>
    %27 = vector.extract_strided_slice %25 {offsets = [0, 32], sizes = [2, 32], strides = [1, 1]} : vector<2x96xf32> to vector<2x32xf32>
    %28 = vector.extract_strided_slice %25 {offsets = [0, 64], sizes = [2, 32], strides = [1, 1]} : vector<2x96xf32> to vector<2x32xf32>
    %29 = vector.extract_strided_slice %19 {offsets = [0, 96], sizes = [2, 32], strides = [1, 1]} : vector<2x128xf32> to vector<2x32xf32>
    %30 = math.tanh %29 : vector<2x32xf32>
    %31 = arith.mulf %27, %13 : vector<2x32xf32>
    %32 = arith.mulf %26, %30 : vector<2x32xf32>
    %33 = arith.addf %31, %32 : vector<2x32xf32>
    %34 = math.tanh %33 : vector<2x32xf32>
    %35 = arith.mulf %28, %34 : vector<2x32xf32>
    %36 = arith.index_cast %14 : i32 to index
    %c0_20 = arith.constant 0 : index
    %37 = vector.load %arg13[%36, %c0_20] : memref<16x32xf32, #tpu.memory_space<vmem>>, vector<2x32xf32>
    tpu.vector_store %arg13[%36, %c0_20], %35 {strides = array<i32>} : memref<16x32xf32, #tpu.memory_space<vmem>>, vector<2x32xf32>,
    %c1_i32 = arith.constant 1 : i32
    %c2_i32_21 = arith.constant 2 : i32
    %38 = arith.muli %c1_i32, %c2_i32_21 : i32
    %39 = arith.index_cast %38 : i32 to index
    %c0_22 = arith.constant 0 : index
    %40 = vector.load %arg12[%39, %c0_22] : memref<16x128xf32, #tpu.memory_space<vmem>>, vector<2x128xf32>
    %c0_23 = arith.constant 0 : index
    %c0_24 = arith.constant 0 : index
    %41 = vector.load %arg4[%c0_23, %c0_24] : memref<32x128xf32, #tpu.memory_space<vmem>>, vector<32x128xf32>
    %cst_25 = arith.constant dense<0.000000e+00> : vector<2x128xf32>
    %42 = tpu.matmul %35, %41, %cst_25 {dimension_numbers = #tpu.dot_dimension_numbers<[1], [0], [0], [1], [0, 0, 1, 1], [], []>} : vector<2x32xf32>, vector<32x128xf32>, vector<2x128xf32> -> vector<2x128xf32>
    %43 = arith.addf %40, %42 : vector<2x128xf32>
    %44 = vector.extract_strided_slice %43 {offsets = [0, 0], sizes = [2, 96], strides = [1, 1]} : vector<2x128xf32> to vector<2x96xf32>
    %45 = arith.negf %44 : vector<2x96xf32>
    %46 = math.exp %45 : vector<2x96xf32>
    %cst_26 = arith.constant 1.000000e+00 : f32
    %47 = vector.broadcast %cst_26 : f32 to vector<2x96xf32>
    %48 = arith.addf %47, %46 : vector<2x96xf32>
    %49 = arith.divf %47, %48 : vector<2x96xf32>
    %50 = vector.extract_strided_slice %49 {offsets = [0, 0], sizes = [2, 32], strides = [1, 1]} : vector<2x96xf32> to vector<2x32xf32>
    %51 = vector.extract_strided_slice %49 {offsets = [0, 32], sizes = [2, 32], strides = [1, 1]} : vector<2x96xf32> to vector<2x32xf32>
    %52 = vector.extract_strided_slice %49 {offsets = [0, 64], sizes = [2, 32], strides = [1, 1]} : vector<2x96xf32> to vector<2x32xf32>
    %53 = vector.extract_strided_slice %43 {offsets = [0, 96], sizes = [2, 32], strides = [1, 1]} : vector<2x128xf32> to vector<2x32xf32>
    %54 = math.tanh %53 : vector<2x32xf32>
    %55 = arith.mulf %51, %33 : vector<2x32xf32>
    %56 = arith.mulf %50, %54 : vector<2x32xf32>
    %57 = arith.addf %55, %56 : vector<2x32xf32>
    %58 = math.tanh %57 : vector<2x32xf32>
    %59 = arith.mulf %52, %58 : vector<2x32xf32>
    %60 = arith.index_cast %38 : i32 to index
    %c0_27 = arith.constant 0 : index
    %61 = vector.load %arg13[%60, %c0_27] : memref<16x32xf32, #tpu.memory_space<vmem>>, vector<2x32xf32>
    tpu.vector_store %arg13[%60, %c0_27], %59 {strides = array<i32>} : memref<16x32xf32, #tpu.memory_space<vmem>>, vector<2x32xf32>,
    %c2_i32_28 = arith.constant 2 : i32
    %c2_i32_29 = arith.constant 2 : i32
    %62 = arith.muli %c2_i32_28, %c2_i32_29 : i32
    %63 = arith.index_cast %62 : i32 to index
    %c0_30 = arith.constant 0 : index
    %64 = vector.load %arg12[%63, %c0_30] : memref<16x128xf32, #tpu.memory_space<vmem>>, vector<2x128xf32>
    %c0_31 = arith.constant 0 : index
    %c0_32 = arith.constant 0 : index
    %65 = vector.load %arg4[%c0_31, %c0_32] : memref<32x128xf32, #tpu.memory_space<vmem>>, vector<32x128xf32>
    %cst_33 = arith.constant dense<0.000000e+00> : vector<2x128xf32>
    %66 = tpu.matmul %59, %65, %cst_33 {dimension_numbers = #tpu.dot_dimension_numbers<[1], [0], [0], [1], [0, 0, 1, 1], [], []>} : vector<2x32xf32>, vector<32x128xf32>, vector<2x128xf32> -> vector<2x128xf32>
    %67 = arith.addf %64, %66 : vector<2x128xf32>
    %68 = vector.extract_strided_slice %67 {offsets = [0, 0], sizes = [2, 96], strides = [1, 1]} : vector<2x128xf32> to vector<2x96xf32>
    %69 = arith.negf %68 : vector<2x96xf32>
    %70 = math.exp %69 : vector<2x96xf32>
    %cst_34 = arith.constant 1.000000e+00 : f32
    %71 = vector.broadcast %cst_34 : f32 to vector<2x96xf32>
    %72 = arith.addf %71, %70 : vector<2x96xf32>
    %73 = arith.divf %71, %72 : vector<2x96xf32>
    %74 = vector.extract_strided_slice %73 {offsets = [0, 0], sizes = [2, 32], strides = [1, 1]} : vector<2x96xf32> to vector<2x32xf32>
    %75 = vector.extract_strided_slice %73 {offsets = [0, 32], sizes = [2, 32], strides = [1, 1]} : vector<2x96xf32> to vector<2x32xf32>
    %76 = vector.extract_strided_slice %73 {offsets = [0, 64], sizes = [2, 32], strides = [1, 1]} : vector<2x96xf32> to vector<2x32xf32>
    %77 = vector.extract_strided_slice %67 {offsets = [0, 96], sizes = [2, 32], strides = [1, 1]} : vector<2x128xf32> to vector<2x32xf32>
    %78 = math.tanh %77 : vector<2x32xf32>
    %79 = arith.mulf %75, %57 : vector<2x32xf32>
    %80 = arith.mulf %74, %78 : vector<2x32xf32>
    %81 = arith.addf %79, %80 : vector<2x32xf32>
    %82 = math.tanh %81 : vector<2x32xf32>
    %83 = arith.mulf %76, %82 : vector<2x32xf32>
    %84 = arith.index_cast %62 : i32 to index
    %c0_35 = arith.constant 0 : index
    %85 = vector.load %arg13[%84, %c0_35] : memref<16x32xf32, #tpu.memory_space<vmem>>, vector<2x32xf32>
    tpu.vector_store %arg13[%84, %c0_35], %83 {strides = array<i32>} : memref<16x32xf32, #tpu.memory_space<vmem>>, vector<2x32xf32>,
    %c3_i32 = arith.constant 3 : i32
    %c2_i32_36 = arith.constant 2 : i32
    %86 = arith.muli %c3_i32, %c2_i32_36 : i32
    %87 = arith.index_cast %86 : i32 to index
    %c0_37 = arith.constant 0 : index
    %88 = vector.load %arg12[%87, %c0_37] : memref<16x128xf32, #tpu.memory_space<vmem>>, vector<2x128xf32>
    %c0_38 = arith.constant 0 : index
    %c0_39 = arith.constant 0 : index
    %89 = vector.load %arg4[%c0_38, %c0_39] : memref<32x128xf32, #tpu.memory_space<vmem>>, vector<32x128xf32>
    %cst_40 = arith.constant dense<0.000000e+00> : vector<2x128xf32>
    %90 = tpu.matmul %83, %89, %cst_40 {dimension_numbers = #tpu.dot_dimension_numbers<[1], [0], [0], [1], [0, 0, 1, 1], [], []>} : vector<2x32xf32>, vector<32x128xf32>, vector<2x128xf32> -> vector<2x128xf32>
    %91 = arith.addf %88, %90 : vector<2x128xf32>
    %92 = vector.extract_strided_slice %91 {offsets = [0, 0], sizes = [2, 96], strides = [1, 1]} : vector<2x128xf32> to vector<2x96xf32>
    %93 = arith.negf %92 : vector<2x96xf32>
    %94 = math.exp %93 : vector<2x96xf32>
    %cst_41 = arith.constant 1.000000e+00 : f32
    %95 = vector.broadcast %cst_41 : f32 to vector<2x96xf32>
    %96 = arith.addf %95, %94 : vector<2x96xf32>
    %97 = arith.divf %95, %96 : vector<2x96xf32>
    %98 = vector.extract_strided_slice %97 {offsets = [0, 0], sizes = [2, 32], strides = [1, 1]} : vector<2x96xf32> to vector<2x32xf32>
    %99 = vector.extract_strided_slice %97 {offsets = [0, 32], sizes = [2, 32], strides = [1, 1]} : vector<2x96xf32> to vector<2x32xf32>
    %100 = vector.extract_strided_slice %97 {offsets = [0, 64], sizes = [2, 32], strides = [1, 1]} : vector<2x96xf32> to vector<2x32xf32>
    %101 = vector.extract_strided_slice %91 {offsets = [0, 96], sizes = [2, 32], strides = [1, 1]} : vector<2x128xf32> to vector<2x32xf32>
    %102 = math.tanh %101 : vector<2x32xf32>
    %103 = arith.mulf %99, %81 : vector<2x32xf32>
    %104 = arith.mulf %98, %102 : vector<2x32xf32>
    %105 = arith.addf %103, %104 : vector<2x32xf32>
    %106 = math.tanh %105 : vector<2x32xf32>
    %107 = arith.mulf %100, %106 : vector<2x32xf32>
    %108 = arith.index_cast %86 : i32 to index
    %c0_42 = arith.constant 0 : index
    %109 = vector.load %arg13[%108, %c0_42] : memref<16x32xf32, #tpu.memory_space<vmem>>, vector<2x32xf32>
    tpu.vector_store %arg13[%108, %c0_42], %107 {strides = array<i32>} : memref<16x32xf32, #tpu.memory_space<vmem>>, vector<2x32xf32>,
    %c4_i32 = arith.constant 4 : i32
    %c2_i32_43 = arith.constant 2 : i32
    %110 = arith.muli %c4_i32, %c2_i32_43 : i32
    %111 = arith.index_cast %110 : i32 to index
    %c0_44 = arith.constant 0 : index
    %112 = vector.load %arg12[%111, %c0_44] : memref<16x128xf32, #tpu.memory_space<vmem>>, vector<2x128xf32>
    %c0_45 = arith.constant 0 : index
    %c0_46 = arith.constant 0 : index
    %113 = vector.load %arg4[%c0_45, %c0_46] : memref<32x128xf32, #tpu.memory_space<vmem>>, vector<32x128xf32>
    %cst_47 = arith.constant dense<0.000000e+00> : vector<2x128xf32>
    %114 = tpu.matmul %107, %113, %cst_47 {dimension_numbers = #tpu.dot_dimension_numbers<[1], [0], [0], [1], [0, 0, 1, 1], [], []>} : vector<2x32xf32>, vector<32x128xf32>, vector<2x128xf32> -> vector<2x128xf32>
    %115 = arith.addf %112, %114 : vector<2x128xf32>
    %116 = vector.extract_strided_slice %115 {offsets = [0, 0], sizes = [2, 96], strides = [1, 1]} : vector<2x128xf32> to vector<2x96xf32>
    %117 = arith.negf %116 : vector<2x96xf32>
    %118 = math.exp %117 : vector<2x96xf32>
    %cst_48 = arith.constant 1.000000e+00 : f32
    %119 = vector.broadcast %cst_48 : f32 to vector<2x96xf32>
    %120 = arith.addf %119, %118 : vector<2x96xf32>
    %121 = arith.divf %119, %120 : vector<2x96xf32>
    %122 = vector.extract_strided_slice %121 {offsets = [0, 0], sizes = [2, 32], strides = [1, 1]} : vector<2x96xf32> to vector<2x32xf32>
    %123 = vector.extract_strided_slice %121 {offsets = [0, 32], sizes = [2, 32], strides = [1, 1]} : vector<2x96xf32> to vector<2x32xf32>
    %124 = vector.extract_strided_slice %121 {offsets = [0, 64], sizes = [2, 32], strides = [1, 1]} : vector<2x96xf32> to vector<2x32xf32>
    %125 = vector.extract_strided_slice %115 {offsets = [0, 96], sizes = [2, 32], strides = [1, 1]} : vector<2x128xf32> to vector<2x32xf32>
    %126 = math.tanh %125 : vector<2x32xf32>
    %127 = arith.mulf %123, %105 : vector<2x32xf32>
    %128 = arith.mulf %122, %126 : vector<2x32xf32>
    %129 = arith.addf %127, %128 : vector<2x32xf32>
    %130 = math.tanh %129 : vector<2x32xf32>
    %131 = arith.mulf %124, %130 : vector<2x32xf32>
    %132 = arith.index_cast %110 : i32 to index
    %c0_49 = arith.constant 0 : index
    %133 = vector.load %arg13[%132, %c0_49] : memref<16x32xf32, #tpu.memory_space<vmem>>, vector<2x32xf32>
    tpu.vector_store %arg13[%132, %c0_49], %131 {strides = array<i32>} : memref<16x32xf32, #tpu.memory_space<vmem>>, vector<2x32xf32>,
    %c5_i32 = arith.constant 5 : i32
    %c2_i32_50 = arith.constant 2 : i32
    %134 = arith.muli %c5_i32, %c2_i32_50 : i32
    %135 = arith.index_cast %134 : i32 to index
    %c0_51 = arith.constant 0 : index
    %136 = vector.load %arg12[%135, %c0_51] : memref<16x128xf32, #tpu.memory_space<vmem>>, vector<2x128xf32>
    %c0_52 = arith.constant 0 : index
    %c0_53 = arith.constant 0 : index
    %137 = vector.load %arg4[%c0_52, %c0_53] : memref<32x128xf32, #tpu.memory_space<vmem>>, vector<32x128xf32>
    %cst_54 = arith.constant dense<0.000000e+00> : vector<2x128xf32>
    %138 = tpu.matmul %131, %137, %cst_54 {dimension_numbers = #tpu.dot_dimension_numbers<[1], [0], [0], [1], [0, 0, 1, 1], [], []>} : vector<2x32xf32>, vector<32x128xf32>, vector<2x128xf32> -> vector<2x128xf32>
    %139 = arith.addf %136, %138 : vector<2x128xf32>
    %140 = vector.extract_strided_slice %139 {offsets = [0, 0], sizes = [2, 96], strides = [1, 1]} : vector<2x128xf32> to vector<2x96xf32>
    %141 = arith.negf %140 : vector<2x96xf32>
    %142 = math.exp %141 : vector<2x96xf32>
    %cst_55 = arith.constant 1.000000e+00 : f32
    %143 = vector.broadcast %cst_55 : f32 to vector<2x96xf32>
    %144 = arith.addf %143, %142 : vector<2x96xf32>
    %145 = arith.divf %143, %144 : vector<2x96xf32>
    %146 = vector.extract_strided_slice %145 {offsets = [0, 0], sizes = [2, 32], strides = [1, 1]} : vector<2x96xf32> to vector<2x32xf32>
    %147 = vector.extract_strided_slice %145 {offsets = [0, 32], sizes = [2, 32], strides = [1, 1]} : vector<2x96xf32> to vector<2x32xf32>
    %148 = vector.extract_strided_slice %145 {offsets = [0, 64], sizes = [2, 32], strides = [1, 1]} : vector<2x96xf32> to vector<2x32xf32>
    %149 = vector.extract_strided_slice %139 {offsets = [0, 96], sizes = [2, 32], strides = [1, 1]} : vector<2x128xf32> to vector<2x32xf32>
    %150 = math.tanh %149 : vector<2x32xf32>
    %151 = arith.mulf %147, %129 : vector<2x32xf32>
    %152 = arith.mulf %146, %150 : vector<2x32xf32>
    %153 = arith.addf %151, %152 : vector<2x32xf32>
    %154 = math.tanh %153 : vector<2x32xf32>
    %155 = arith.mulf %148, %154 : vector<2x32xf32>
    %156 = arith.index_cast %134 : i32 to index
    %c0_56 = arith.constant 0 : index
    %157 = vector.load %arg13[%156, %c0_56] : memref<16x32xf32, #tpu.memory_space<vmem>>, vector<2x32xf32>
    tpu.vector_store %arg13[%156, %c0_56], %155 {strides = array<i32>} : memref<16x32xf32, #tpu.memory_space<vmem>>, vector<2x32xf32>,
    %c6_i32 = arith.constant 6 : i32
    %c2_i32_57 = arith.constant 2 : i32
    %158 = arith.muli %c6_i32, %c2_i32_57 : i32
    %159 = arith.index_cast %158 : i32 to index
    %c0_58 = arith.constant 0 : index
    %160 = vector.load %arg12[%159, %c0_58] : memref<16x128xf32, #tpu.memory_space<vmem>>, vector<2x128xf32>
    %c0_59 = arith.constant 0 : index
    %c0_60 = arith.constant 0 : index
    %161 = vector.load %arg4[%c0_59, %c0_60] : memref<32x128xf32, #tpu.memory_space<vmem>>, vector<32x128xf32>
    %cst_61 = arith.constant dense<0.000000e+00> : vector<2x128xf32>
    %162 = tpu.matmul %155, %161, %cst_61 {dimension_numbers = #tpu.dot_dimension_numbers<[1], [0], [0], [1], [0, 0, 1, 1], [], []>} : vector<2x32xf32>, vector<32x128xf32>, vector<2x128xf32> -> vector<2x128xf32>
    %163 = arith.addf %160, %162 : vector<2x128xf32>
    %164 = vector.extract_strided_slice %163 {offsets = [0, 0], sizes = [2, 96], strides = [1, 1]} : vector<2x128xf32> to vector<2x96xf32>
    %165 = arith.negf %164 : vector<2x96xf32>
    %166 = math.exp %165 : vector<2x96xf32>
    %cst_62 = arith.constant 1.000000e+00 : f32
    %167 = vector.broadcast %cst_62 : f32 to vector<2x96xf32>
    %168 = arith.addf %167, %166 : vector<2x96xf32>
    %169 = arith.divf %167, %168 : vector<2x96xf32>
    %170 = vector.extract_strided_slice %169 {offsets = [0, 0], sizes = [2, 32], strides = [1, 1]} : vector<2x96xf32> to vector<2x32xf32>
    %171 = vector.extract_strided_slice %169 {offsets = [0, 32], sizes = [2, 32], strides = [1, 1]} : vector<2x96xf32> to vector<2x32xf32>
    %172 = vector.extract_strided_slice %169 {offsets = [0, 64], sizes = [2, 32], strides = [1, 1]} : vector<2x96xf32> to vector<2x32xf32>
    %173 = vector.extract_strided_slice %163 {offsets = [0, 96], sizes = [2, 32], strides = [1, 1]} : vector<2x128xf32> to vector<2x32xf32>
    %174 = math.tanh %173 : vector<2x32xf32>
    %175 = arith.mulf %171, %153 : vector<2x32xf32>
    %176 = arith.mulf %170, %174 : vector<2x32xf32>
    %177 = arith.addf %175, %176 : vector<2x32xf32>
    %178 = math.tanh %177 : vector<2x32xf32>
    %179 = arith.mulf %172, %178 : vector<2x32xf32>
    %180 = arith.index_cast %158 : i32 to index
    %c0_63 = arith.constant 0 : index
    %181 = vector.load %arg13[%180, %c0_63] : memref<16x32xf32, #tpu.memory_space<vmem>>, vector<2x32xf32>
    tpu.vector_store %arg13[%180, %c0_63], %179 {strides = array<i32>} : memref<16x32xf32, #tpu.memory_space<vmem>>, vector<2x32xf32>,
    %c7_i32 = arith.constant 7 : i32
    %c2_i32_64 = arith.constant 2 : i32
    %182 = arith.muli %c7_i32, %c2_i32_64 : i32
    %183 = arith.index_cast %182 : i32 to index
    %c0_65 = arith.constant 0 : index
    %184 = vector.load %arg12[%183, %c0_65] : memref<16x128xf32, #tpu.memory_space<vmem>>, vector<2x128xf32>
    %c0_66 = arith.constant 0 : index
    %c0_67 = arith.constant 0 : index
    %185 = vector.load %arg4[%c0_66, %c0_67] : memref<32x128xf32, #tpu.memory_space<vmem>>, vector<32x128xf32>
    %cst_68 = arith.constant dense<0.000000e+00> : vector<2x128xf32>
    %186 = tpu.matmul %179, %185, %cst_68 {dimension_numbers = #tpu.dot_dimension_numbers<[1], [0], [0], [1], [0, 0, 1, 1], [], []>} : vector<2x32xf32>, vector<32x128xf32>, vector<2x128xf32> -> vector<2x128xf32>
    %187 = arith.addf %184, %186 : vector<2x128xf32>
    %188 = vector.extract_strided_slice %187 {offsets = [0, 0], sizes = [2, 96], strides = [1, 1]} : vector<2x128xf32> to vector<2x96xf32>
    %189 = arith.negf %188 : vector<2x96xf32>
    %190 = math.exp %189 : vector<2x96xf32>
    %cst_69 = arith.constant 1.000000e+00 : f32
    %191 = vector.broadcast %cst_69 : f32 to vector<2x96xf32>
    %192 = arith.addf %191, %190 : vector<2x96xf32>
    %193 = arith.divf %191, %192 : vector<2x96xf32>
    %194 = vector.extract_strided_slice %193 {offsets = [0, 0], sizes = [2, 32], strides = [1, 1]} : vector<2x96xf32> to vector<2x32xf32>
    %195 = vector.extract_strided_slice %193 {offsets = [0, 32], sizes = [2, 32], strides = [1, 1]} : vector<2x96xf32> to vector<2x32xf32>
    %196 = vector.extract_strided_slice %193 {offsets = [0, 64], sizes = [2, 32], strides = [1, 1]} : vector<2x96xf32> to vector<2x32xf32>
    %197 = vector.extract_strided_slice %187 {offsets = [0, 96], sizes = [2, 32], strides = [1, 1]} : vector<2x128xf32> to vector<2x32xf32>
    %198 = math.tanh %197 : vector<2x32xf32>
    %199 = arith.mulf %195, %177 : vector<2x32xf32>
    %200 = arith.mulf %194, %198 : vector<2x32xf32>
    %201 = arith.addf %199, %200 : vector<2x32xf32>
    %202 = math.tanh %201 : vector<2x32xf32>
    %203 = arith.mulf %196, %202 : vector<2x32xf32>
    %204 = arith.index_cast %182 : i32 to index
    %c0_70 = arith.constant 0 : index
    %205 = vector.load %arg13[%204, %c0_70] : memref<16x32xf32, #tpu.memory_space<vmem>>, vector<2x32xf32>
    tpu.vector_store %arg13[%204, %c0_70], %203 {strides = array<i32>} : memref<16x32xf32, #tpu.memory_space<vmem>>, vector<2x32xf32>,
    %c8_i32 = arith.constant 8 : i32
    %c0_71 = arith.constant 0 : index
    %c0_72 = arith.constant 0 : index
    %c0_73 = arith.constant 0 : index
    %206 = vector.load %arg10[%c0_71, %c0_72, %c0_73] : memref<2x2x32xf32, #tpu.memory_space<vmem>>, vector<1x2x32xf32>
    %207 = vector.shape_cast %206 : vector<1x2x32xf32> to vector<2x32xf32>
    %208 = vector.shape_cast %203 : vector<2x32xf32> to vector<1x2x32xf32>
    tpu.vector_store %arg10[%c0_71, %c0_72, %c0_73], %208 {strides = array<i32>} : memref<2x2x32xf32, #tpu.memory_space<vmem>>, vector<1x2x32xf32>,
    %c0_74 = arith.constant 0 : index
    %c0_75 = arith.constant 0 : index
    %c0_76 = arith.constant 0 : index
    %209 = vector.load %arg11[%c0_74, %c0_75, %c0_76] : memref<2x2x32xf32, #tpu.memory_space<vmem>>, vector<1x2x32xf32>
    %210 = vector.shape_cast %209 : vector<1x2x32xf32> to vector<2x32xf32>
    %211 = vector.shape_cast %201 : vector<2x32xf32> to vector<1x2x32xf32>
    tpu.vector_store %arg11[%c0_74, %c0_75, %c0_76], %211 {strides = array<i32>} : memref<2x2x32xf32, #tpu.memory_space<vmem>>, vector<1x2x32xf32>,
    %c0_77 = arith.constant 0 : index
    %c0_78 = arith.constant 0 : index
    %212 = vector.load %arg13[%c0_77, %c0_78] : memref<16x32xf32, #tpu.memory_space<vmem>>, vector<16x32xf32>
    %c0_79 = arith.constant 0 : index
    %c0_80 = arith.constant 0 : index
    %213 = vector.load %arg6[%c0_79, %c0_80] : memref<32x128xf32, #tpu.memory_space<vmem>>, vector<32x128xf32>
    %cst_81 = arith.constant dense<0.000000e+00> : vector<16x128xf32>
    %214 = tpu.matmul %212, %213, %cst_81 {dimension_numbers = #tpu.dot_dimension_numbers<[1], [0], [0], [1], [0, 0, 1, 1], [], []>} : vector<16x32xf32>, vector<32x128xf32>, vector<16x128xf32> -> vector<16x128xf32>
    %c0_82 = arith.constant 0 : index
    %c0_83 = arith.constant 0 : index
    %215 = vector.load %arg8[%c0_82, %c0_83] : memref<1x128xf32, #tpu.memory_space<vmem>>, vector<1x128xf32>
    %216 = vector.broadcast %215 : vector<1x128xf32> to vector<16x128xf32>
    %217 = arith.addf %214, %216 : vector<16x128xf32>
    %c0_84 = arith.constant 0 : index
    %c0_85 = arith.constant 0 : index
    %218 = vector.load %arg12[%c0_84, %c0_85] : memref<16x128xf32, #tpu.memory_space<vmem>>, vector<16x128xf32>
    tpu.vector_store %arg12[%c0_84, %c0_85], %217 {strides = array<i32>} : memref<16x128xf32, #tpu.memory_space<vmem>>, vector<16x128xf32>,
    %c1 = arith.constant 1 : index
    %c0_86 = arith.constant 0 : index
    %c0_87 = arith.constant 0 : index
    %219 = vector.load %arg10[%c1, %c0_86, %c0_87] : memref<2x2x32xf32, #tpu.memory_space<vmem>>, vector<1x2x32xf32>
    %220 = vector.shape_cast %219 : vector<1x2x32xf32> to vector<2x32xf32>
    %c1_88 = arith.constant 1 : index
    %c0_89 = arith.constant 0 : index
    %c0_90 = arith.constant 0 : index
    %221 = vector.load %arg11[%c1_88, %c0_89, %c0_90] : memref<2x2x32xf32, #tpu.memory_space<vmem>>, vector<1x2x32xf32>
    %222 = vector.shape_cast %221 : vector<1x2x32xf32> to vector<2x32xf32>
    %c0_i32_91 = arith.constant 0 : i32
    %c2_i32_92 = arith.constant 2 : i32
    %223 = arith.muli %c0_i32_91, %c2_i32_92 : i32
    %224 = arith.index_cast %223 : i32 to index
    %c0_93 = arith.constant 0 : index
    %225 = vector.load %arg12[%224, %c0_93] : memref<16x128xf32, #tpu.memory_space<vmem>>, vector<2x128xf32>
    %c0_94 = arith.constant 0 : index
    %c0_95 = arith.constant 0 : index
    %226 = vector.load %arg7[%c0_94, %c0_95] : memref<32x128xf32, #tpu.memory_space<vmem>>, vector<32x128xf32>
    %cst_96 = arith.constant dense<0.000000e+00> : vector<2x128xf32>
    %227 = tpu.matmul %220, %226, %cst_96 {dimension_numbers = #tpu.dot_dimension_numbers<[1], [0], [0], [1], [0, 0, 1, 1], [], []>} : vector<2x32xf32>, vector<32x128xf32>, vector<2x128xf32> -> vector<2x128xf32>
    %228 = arith.addf %225, %227 : vector<2x128xf32>
    %229 = vector.extract_strided_slice %228 {offsets = [0, 0], sizes = [2, 96], strides = [1, 1]} : vector<2x128xf32> to vector<2x96xf32>
    %230 = arith.negf %229 : vector<2x96xf32>
    %231 = math.exp %230 : vector<2x96xf32>
    %cst_97 = arith.constant 1.000000e+00 : f32
    %232 = vector.broadcast %cst_97 : f32 to vector<2x96xf32>
    %233 = arith.addf %232, %231 : vector<2x96xf32>
    %234 = arith.divf %232, %233 : vector<2x96xf32>
    %235 = vector.extract_strided_slice %234 {offsets = [0, 0], sizes = [2, 32], strides = [1, 1]} : vector<2x96xf32> to vector<2x32xf32>
    %236 = vector.extract_strided_slice %234 {offsets = [0, 32], sizes = [2, 32], strides = [1, 1]} : vector<2x96xf32> to vector<2x32xf32>
    %237 = vector.extract_strided_slice %234 {offsets = [0, 64], sizes = [2, 32], strides = [1, 1]} : vector<2x96xf32> to vector<2x32xf32>
    %238 = vector.extract_strided_slice %228 {offsets = [0, 96], sizes = [2, 32], strides = [1, 1]} : vector<2x128xf32> to vector<2x32xf32>
    %239 = math.tanh %238 : vector<2x32xf32>
    %240 = arith.mulf %236, %222 : vector<2x32xf32>
    %241 = arith.mulf %235, %239 : vector<2x32xf32>
    %242 = arith.addf %240, %241 : vector<2x32xf32>
    %243 = math.tanh %242 : vector<2x32xf32>
    %244 = arith.mulf %237, %243 : vector<2x32xf32>
    %245 = arith.index_cast %223 : i32 to index
    %c0_98 = arith.constant 0 : index
    %246 = vector.load %arg13[%245, %c0_98] : memref<16x32xf32, #tpu.memory_space<vmem>>, vector<2x32xf32>
    tpu.vector_store %arg13[%245, %c0_98], %244 {strides = array<i32>} : memref<16x32xf32, #tpu.memory_space<vmem>>, vector<2x32xf32>,
    %c1_i32_99 = arith.constant 1 : i32
    %c2_i32_100 = arith.constant 2 : i32
    %247 = arith.muli %c1_i32_99, %c2_i32_100 : i32
    %248 = arith.index_cast %247 : i32 to index
    %c0_101 = arith.constant 0 : index
    %249 = vector.load %arg12[%248, %c0_101] : memref<16x128xf32, #tpu.memory_space<vmem>>, vector<2x128xf32>
    %c0_102 = arith.constant 0 : index
    %c0_103 = arith.constant 0 : index
    %250 = vector.load %arg7[%c0_102, %c0_103] : memref<32x128xf32, #tpu.memory_space<vmem>>, vector<32x128xf32>
    %cst_104 = arith.constant dense<0.000000e+00> : vector<2x128xf32>
    %251 = tpu.matmul %244, %250, %cst_104 {dimension_numbers = #tpu.dot_dimension_numbers<[1], [0], [0], [1], [0, 0, 1, 1], [], []>} : vector<2x32xf32>, vector<32x128xf32>, vector<2x128xf32> -> vector<2x128xf32>
    %252 = arith.addf %249, %251 : vector<2x128xf32>
    %253 = vector.extract_strided_slice %252 {offsets = [0, 0], sizes = [2, 96], strides = [1, 1]} : vector<2x128xf32> to vector<2x96xf32>
    %254 = arith.negf %253 : vector<2x96xf32>
    %255 = math.exp %254 : vector<2x96xf32>
    %cst_105 = arith.constant 1.000000e+00 : f32
    %256 = vector.broadcast %cst_105 : f32 to vector<2x96xf32>
    %257 = arith.addf %256, %255 : vector<2x96xf32>
    %258 = arith.divf %256, %257 : vector<2x96xf32>
    %259 = vector.extract_strided_slice %258 {offsets = [0, 0], sizes = [2, 32], strides = [1, 1]} : vector<2x96xf32> to vector<2x32xf32>
    %260 = vector.extract_strided_slice %258 {offsets = [0, 32], sizes = [2, 32], strides = [1, 1]} : vector<2x96xf32> to vector<2x32xf32>
    %261 = vector.extract_strided_slice %258 {offsets = [0, 64], sizes = [2, 32], strides = [1, 1]} : vector<2x96xf32> to vector<2x32xf32>
    %262 = vector.extract_strided_slice %252 {offsets = [0, 96], sizes = [2, 32], strides = [1, 1]} : vector<2x128xf32> to vector<2x32xf32>
    %263 = math.tanh %262 : vector<2x32xf32>
    %264 = arith.mulf %260, %242 : vector<2x32xf32>
    %265 = arith.mulf %259, %263 : vector<2x32xf32>
    %266 = arith.addf %264, %265 : vector<2x32xf32>
    %267 = math.tanh %266 : vector<2x32xf32>
    %268 = arith.mulf %261, %267 : vector<2x32xf32>
    %269 = arith.index_cast %247 : i32 to index
    %c0_106 = arith.constant 0 : index
    %270 = vector.load %arg13[%269, %c0_106] : memref<16x32xf32, #tpu.memory_space<vmem>>, vector<2x32xf32>
    tpu.vector_store %arg13[%269, %c0_106], %268 {strides = array<i32>} : memref<16x32xf32, #tpu.memory_space<vmem>>, vector<2x32xf32>,
    %c2_i32_107 = arith.constant 2 : i32
    %c2_i32_108 = arith.constant 2 : i32
    %271 = arith.muli %c2_i32_107, %c2_i32_108 : i32
    %272 = arith.index_cast %271 : i32 to index
    %c0_109 = arith.constant 0 : index
    %273 = vector.load %arg12[%272, %c0_109] : memref<16x128xf32, #tpu.memory_space<vmem>>, vector<2x128xf32>
    %c0_110 = arith.constant 0 : index
    %c0_111 = arith.constant 0 : index
    %274 = vector.load %arg7[%c0_110, %c0_111] : memref<32x128xf32, #tpu.memory_space<vmem>>, vector<32x128xf32>
    %cst_112 = arith.constant dense<0.000000e+00> : vector<2x128xf32>
    %275 = tpu.matmul %268, %274, %cst_112 {dimension_numbers = #tpu.dot_dimension_numbers<[1], [0], [0], [1], [0, 0, 1, 1], [], []>} : vector<2x32xf32>, vector<32x128xf32>, vector<2x128xf32> -> vector<2x128xf32>
    %276 = arith.addf %273, %275 : vector<2x128xf32>
    %277 = vector.extract_strided_slice %276 {offsets = [0, 0], sizes = [2, 96], strides = [1, 1]} : vector<2x128xf32> to vector<2x96xf32>
    %278 = arith.negf %277 : vector<2x96xf32>
    %279 = math.exp %278 : vector<2x96xf32>
    %cst_113 = arith.constant 1.000000e+00 : f32
    %280 = vector.broadcast %cst_113 : f32 to vector<2x96xf32>
    %281 = arith.addf %280, %279 : vector<2x96xf32>
    %282 = arith.divf %280, %281 : vector<2x96xf32>
    %283 = vector.extract_strided_slice %282 {offsets = [0, 0], sizes = [2, 32], strides = [1, 1]} : vector<2x96xf32> to vector<2x32xf32>
    %284 = vector.extract_strided_slice %282 {offsets = [0, 32], sizes = [2, 32], strides = [1, 1]} : vector<2x96xf32> to vector<2x32xf32>
    %285 = vector.extract_strided_slice %282 {offsets = [0, 64], sizes = [2, 32], strides = [1, 1]} : vector<2x96xf32> to vector<2x32xf32>
    %286 = vector.extract_strided_slice %276 {offsets = [0, 96], sizes = [2, 32], strides = [1, 1]} : vector<2x128xf32> to vector<2x32xf32>
    %287 = math.tanh %286 : vector<2x32xf32>
    %288 = arith.mulf %284, %266 : vector<2x32xf32>
    %289 = arith.mulf %283, %287 : vector<2x32xf32>
    %290 = arith.addf %288, %289 : vector<2x32xf32>
    %291 = math.tanh %290 : vector<2x32xf32>
    %292 = arith.mulf %285, %291 : vector<2x32xf32>
    %293 = arith.index_cast %271 : i32 to index
    %c0_114 = arith.constant 0 : index
    %294 = vector.load %arg13[%293, %c0_114] : memref<16x32xf32, #tpu.memory_space<vmem>>, vector<2x32xf32>
    tpu.vector_store %arg13[%293, %c0_114], %292 {strides = array<i32>} : memref<16x32xf32, #tpu.memory_space<vmem>>, vector<2x32xf32>,
    %c3_i32_115 = arith.constant 3 : i32
    %c2_i32_116 = arith.constant 2 : i32
    %295 = arith.muli %c3_i32_115, %c2_i32_116 : i32
    %296 = arith.index_cast %295 : i32 to index
    %c0_117 = arith.constant 0 : index
    %297 = vector.load %arg12[%296, %c0_117] : memref<16x128xf32, #tpu.memory_space<vmem>>, vector<2x128xf32>
    %c0_118 = arith.constant 0 : index
    %c0_119 = arith.constant 0 : index
    %298 = vector.load %arg7[%c0_118, %c0_119] : memref<32x128xf32, #tpu.memory_space<vmem>>, vector<32x128xf32>
    %cst_120 = arith.constant dense<0.000000e+00> : vector<2x128xf32>
    %299 = tpu.matmul %292, %298, %cst_120 {dimension_numbers = #tpu.dot_dimension_numbers<[1], [0], [0], [1], [0, 0, 1, 1], [], []>} : vector<2x32xf32>, vector<32x128xf32>, vector<2x128xf32> -> vector<2x128xf32>
    %300 = arith.addf %297, %299 : vector<2x128xf32>
    %301 = vector.extract_strided_slice %300 {offsets = [0, 0], sizes = [2, 96], strides = [1, 1]} : vector<2x128xf32> to vector<2x96xf32>
    %302 = arith.negf %301 : vector<2x96xf32>
    %303 = math.exp %302 : vector<2x96xf32>
    %cst_121 = arith.constant 1.000000e+00 : f32
    %304 = vector.broadcast %cst_121 : f32 to vector<2x96xf32>
    %305 = arith.addf %304, %303 : vector<2x96xf32>
    %306 = arith.divf %304, %305 : vector<2x96xf32>
    %307 = vector.extract_strided_slice %306 {offsets = [0, 0], sizes = [2, 32], strides = [1, 1]} : vector<2x96xf32> to vector<2x32xf32>
    %308 = vector.extract_strided_slice %306 {offsets = [0, 32], sizes = [2, 32], strides = [1, 1]} : vector<2x96xf32> to vector<2x32xf32>
    %309 = vector.extract_strided_slice %306 {offsets = [0, 64], sizes = [2, 32], strides = [1, 1]} : vector<2x96xf32> to vector<2x32xf32>
    %310 = vector.extract_strided_slice %300 {offsets = [0, 96], sizes = [2, 32], strides = [1, 1]} : vector<2x128xf32> to vector<2x32xf32>
    %311 = math.tanh %310 : vector<2x32xf32>
    %312 = arith.mulf %308, %290 : vector<2x32xf32>
    %313 = arith.mulf %307, %311 : vector<2x32xf32>
    %314 = arith.addf %312, %313 : vector<2x32xf32>
    %315 = math.tanh %314 : vector<2x32xf32>
    %316 = arith.mulf %309, %315 : vector<2x32xf32>
    %317 = arith.index_cast %295 : i32 to index
    %c0_122 = arith.constant 0 : index
    %318 = vector.load %arg13[%317, %c0_122] : memref<16x32xf32, #tpu.memory_space<vmem>>, vector<2x32xf32>
    tpu.vector_store %arg13[%317, %c0_122], %316 {strides = array<i32>} : memref<16x32xf32, #tpu.memory_space<vmem>>, vector<2x32xf32>,
    %c4_i32_123 = arith.constant 4 : i32
    %c2_i32_124 = arith.constant 2 : i32
    %319 = arith.muli %c4_i32_123, %c2_i32_124 : i32
    %320 = arith.index_cast %319 : i32 to index
    %c0_125 = arith.constant 0 : index
    %321 = vector.load %arg12[%320, %c0_125] : memref<16x128xf32, #tpu.memory_space<vmem>>, vector<2x128xf32>
    %c0_126 = arith.constant 0 : index
    %c0_127 = arith.constant 0 : index
    %322 = vector.load %arg7[%c0_126, %c0_127] : memref<32x128xf32, #tpu.memory_space<vmem>>, vector<32x128xf32>
    %cst_128 = arith.constant dense<0.000000e+00> : vector<2x128xf32>
    %323 = tpu.matmul %316, %322, %cst_128 {dimension_numbers = #tpu.dot_dimension_numbers<[1], [0], [0], [1], [0, 0, 1, 1], [], []>} : vector<2x32xf32>, vector<32x128xf32>, vector<2x128xf32> -> vector<2x128xf32>
    %324 = arith.addf %321, %323 : vector<2x128xf32>
    %325 = vector.extract_strided_slice %324 {offsets = [0, 0], sizes = [2, 96], strides = [1, 1]} : vector<2x128xf32> to vector<2x96xf32>
    %326 = arith.negf %325 : vector<2x96xf32>
    %327 = math.exp %326 : vector<2x96xf32>
    %cst_129 = arith.constant 1.000000e+00 : f32
    %328 = vector.broadcast %cst_129 : f32 to vector<2x96xf32>
    %329 = arith.addf %328, %327 : vector<2x96xf32>
    %330 = arith.divf %328, %329 : vector<2x96xf32>
    %331 = vector.extract_strided_slice %330 {offsets = [0, 0], sizes = [2, 32], strides = [1, 1]} : vector<2x96xf32> to vector<2x32xf32>
    %332 = vector.extract_strided_slice %330 {offsets = [0, 32], sizes = [2, 32], strides = [1, 1]} : vector<2x96xf32> to vector<2x32xf32>
    %333 = vector.extract_strided_slice %330 {offsets = [0, 64], sizes = [2, 32], strides = [1, 1]} : vector<2x96xf32> to vector<2x32xf32>
    %334 = vector.extract_strided_slice %324 {offsets = [0, 96], sizes = [2, 32], strides = [1, 1]} : vector<2x128xf32> to vector<2x32xf32>
    %335 = math.tanh %334 : vector<2x32xf32>
    %336 = arith.mulf %332, %314 : vector<2x32xf32>
    %337 = arith.mulf %331, %335 : vector<2x32xf32>
    %338 = arith.addf %336, %337 : vector<2x32xf32>
    %339 = math.tanh %338 : vector<2x32xf32>
    %340 = arith.mulf %333, %339 : vector<2x32xf32>
    %341 = arith.index_cast %319 : i32 to index
    %c0_130 = arith.constant 0 : index
    %342 = vector.load %arg13[%341, %c0_130] : memref<16x32xf32, #tpu.memory_space<vmem>>, vector<2x32xf32>
    tpu.vector_store %arg13[%341, %c0_130], %340 {strides = array<i32>} : memref<16x32xf32, #tpu.memory_space<vmem>>, vector<2x32xf32>,
    %c5_i32_131 = arith.constant 5 : i32
    %c2_i32_132 = arith.constant 2 : i32
    %343 = arith.muli %c5_i32_131, %c2_i32_132 : i32
    %344 = arith.index_cast %343 : i32 to index
    %c0_133 = arith.constant 0 : index
    %345 = vector.load %arg12[%344, %c0_133] : memref<16x128xf32, #tpu.memory_space<vmem>>, vector<2x128xf32>
    %c0_134 = arith.constant 0 : index
    %c0_135 = arith.constant 0 : index
    %346 = vector.load %arg7[%c0_134, %c0_135] : memref<32x128xf32, #tpu.memory_space<vmem>>, vector<32x128xf32>
    %cst_136 = arith.constant dense<0.000000e+00> : vector<2x128xf32>
    %347 = tpu.matmul %340, %346, %cst_136 {dimension_numbers = #tpu.dot_dimension_numbers<[1], [0], [0], [1], [0, 0, 1, 1], [], []>} : vector<2x32xf32>, vector<32x128xf32>, vector<2x128xf32> -> vector<2x128xf32>
    %348 = arith.addf %345, %347 : vector<2x128xf32>
    %349 = vector.extract_strided_slice %348 {offsets = [0, 0], sizes = [2, 96], strides = [1, 1]} : vector<2x128xf32> to vector<2x96xf32>
    %350 = arith.negf %349 : vector<2x96xf32>
    %351 = math.exp %350 : vector<2x96xf32>
    %cst_137 = arith.constant 1.000000e+00 : f32
    %352 = vector.broadcast %cst_137 : f32 to vector<2x96xf32>
    %353 = arith.addf %352, %351 : vector<2x96xf32>
    %354 = arith.divf %352, %353 : vector<2x96xf32>
    %355 = vector.extract_strided_slice %354 {offsets = [0, 0], sizes = [2, 32], strides = [1, 1]} : vector<2x96xf32> to vector<2x32xf32>
    %356 = vector.extract_strided_slice %354 {offsets = [0, 32], sizes = [2, 32], strides = [1, 1]} : vector<2x96xf32> to vector<2x32xf32>
    %357 = vector.extract_strided_slice %354 {offsets = [0, 64], sizes = [2, 32], strides = [1, 1]} : vector<2x96xf32> to vector<2x32xf32>
    %358 = vector.extract_strided_slice %348 {offsets = [0, 96], sizes = [2, 32], strides = [1, 1]} : vector<2x128xf32> to vector<2x32xf32>
    %359 = math.tanh %358 : vector<2x32xf32>
    %360 = arith.mulf %356, %338 : vector<2x32xf32>
    %361 = arith.mulf %355, %359 : vector<2x32xf32>
    %362 = arith.addf %360, %361 : vector<2x32xf32>
    %363 = math.tanh %362 : vector<2x32xf32>
    %364 = arith.mulf %357, %363 : vector<2x32xf32>
    %365 = arith.index_cast %343 : i32 to index
    %c0_138 = arith.constant 0 : index
    %366 = vector.load %arg13[%365, %c0_138] : memref<16x32xf32, #tpu.memory_space<vmem>>, vector<2x32xf32>
    tpu.vector_store %arg13[%365, %c0_138], %364 {strides = array<i32>} : memref<16x32xf32, #tpu.memory_space<vmem>>, vector<2x32xf32>,
    %c6_i32_139 = arith.constant 6 : i32
    %c2_i32_140 = arith.constant 2 : i32
    %367 = arith.muli %c6_i32_139, %c2_i32_140 : i32
    %368 = arith.index_cast %367 : i32 to index
    %c0_141 = arith.constant 0 : index
    %369 = vector.load %arg12[%368, %c0_141] : memref<16x128xf32, #tpu.memory_space<vmem>>, vector<2x128xf32>
    %c0_142 = arith.constant 0 : index
    %c0_143 = arith.constant 0 : index
    %370 = vector.load %arg7[%c0_142, %c0_143] : memref<32x128xf32, #tpu.memory_space<vmem>>, vector<32x128xf32>
    %cst_144 = arith.constant dense<0.000000e+00> : vector<2x128xf32>
    %371 = tpu.matmul %364, %370, %cst_144 {dimension_numbers = #tpu.dot_dimension_numbers<[1], [0], [0], [1], [0, 0, 1, 1], [], []>} : vector<2x32xf32>, vector<32x128xf32>, vector<2x128xf32> -> vector<2x128xf32>
    %372 = arith.addf %369, %371 : vector<2x128xf32>
    %373 = vector.extract_strided_slice %372 {offsets = [0, 0], sizes = [2, 96], strides = [1, 1]} : vector<2x128xf32> to vector<2x96xf32>
    %374 = arith.negf %373 : vector<2x96xf32>
    %375 = math.exp %374 : vector<2x96xf32>
    %cst_145 = arith.constant 1.000000e+00 : f32
    %376 = vector.broadcast %cst_145 : f32 to vector<2x96xf32>
    %377 = arith.addf %376, %375 : vector<2x96xf32>
    %378 = arith.divf %376, %377 : vector<2x96xf32>
    %379 = vector.extract_strided_slice %378 {offsets = [0, 0], sizes = [2, 32], strides = [1, 1]} : vector<2x96xf32> to vector<2x32xf32>
    %380 = vector.extract_strided_slice %378 {offsets = [0, 32], sizes = [2, 32], strides = [1, 1]} : vector<2x96xf32> to vector<2x32xf32>
    %381 = vector.extract_strided_slice %378 {offsets = [0, 64], sizes = [2, 32], strides = [1, 1]} : vector<2x96xf32> to vector<2x32xf32>
    %382 = vector.extract_strided_slice %372 {offsets = [0, 96], sizes = [2, 32], strides = [1, 1]} : vector<2x128xf32> to vector<2x32xf32>
    %383 = math.tanh %382 : vector<2x32xf32>
    %384 = arith.mulf %380, %362 : vector<2x32xf32>
    %385 = arith.mulf %379, %383 : vector<2x32xf32>
    %386 = arith.addf %384, %385 : vector<2x32xf32>
    %387 = math.tanh %386 : vector<2x32xf32>
    %388 = arith.mulf %381, %387 : vector<2x32xf32>
    %389 = arith.index_cast %367 : i32 to index
    %c0_146 = arith.constant 0 : index
    %390 = vector.load %arg13[%389, %c0_146] : memref<16x32xf32, #tpu.memory_space<vmem>>, vector<2x32xf32>
    tpu.vector_store %arg13[%389, %c0_146], %388 {strides = array<i32>} : memref<16x32xf32, #tpu.memory_space<vmem>>, vector<2x32xf32>,
    %c7_i32_147 = arith.constant 7 : i32
    %c2_i32_148 = arith.constant 2 : i32
    %391 = arith.muli %c7_i32_147, %c2_i32_148 : i32
    %392 = arith.index_cast %391 : i32 to index
    %c0_149 = arith.constant 0 : index
    %393 = vector.load %arg12[%392, %c0_149] : memref<16x128xf32, #tpu.memory_space<vmem>>, vector<2x128xf32>
    %c0_150 = arith.constant 0 : index
    %c0_151 = arith.constant 0 : index
    %394 = vector.load %arg7[%c0_150, %c0_151] : memref<32x128xf32, #tpu.memory_space<vmem>>, vector<32x128xf32>
    %cst_152 = arith.constant dense<0.000000e+00> : vector<2x128xf32>
    %395 = tpu.matmul %388, %394, %cst_152 {dimension_numbers = #tpu.dot_dimension_numbers<[1], [0], [0], [1], [0, 0, 1, 1], [], []>} : vector<2x32xf32>, vector<32x128xf32>, vector<2x128xf32> -> vector<2x128xf32>
    %396 = arith.addf %393, %395 : vector<2x128xf32>
    %397 = vector.extract_strided_slice %396 {offsets = [0, 0], sizes = [2, 96], strides = [1, 1]} : vector<2x128xf32> to vector<2x96xf32>
    %398 = arith.negf %397 : vector<2x96xf32>
    %399 = math.exp %398 : vector<2x96xf32>
    %cst_153 = arith.constant 1.000000e+00 : f32
    %400 = vector.broadcast %cst_153 : f32 to vector<2x96xf32>
    %401 = arith.addf %400, %399 : vector<2x96xf32>
    %402 = arith.divf %400, %401 : vector<2x96xf32>
    %403 = vector.extract_strided_slice %402 {offsets = [0, 0], sizes = [2, 32], strides = [1, 1]} : vector<2x96xf32> to vector<2x32xf32>
    %404 = vector.extract_strided_slice %402 {offsets = [0, 32], sizes = [2, 32], strides = [1, 1]} : vector<2x96xf32> to vector<2x32xf32>
    %405 = vector.extract_strided_slice %402 {offsets = [0, 64], sizes = [2, 32], strides = [1, 1]} : vector<2x96xf32> to vector<2x32xf32>
    %406 = vector.extract_strided_slice %396 {offsets = [0, 96], sizes = [2, 32], strides = [1, 1]} : vector<2x128xf32> to vector<2x32xf32>
    %407 = math.tanh %406 : vector<2x32xf32>
    %408 = arith.mulf %404, %386 : vector<2x32xf32>
    %409 = arith.mulf %403, %407 : vector<2x32xf32>
    %410 = arith.addf %408, %409 : vector<2x32xf32>
    %411 = math.tanh %410 : vector<2x32xf32>
    %412 = arith.mulf %405, %411 : vector<2x32xf32>
    %413 = arith.index_cast %391 : i32 to index
    %c0_154 = arith.constant 0 : index
    %414 = vector.load %arg13[%413, %c0_154] : memref<16x32xf32, #tpu.memory_space<vmem>>, vector<2x32xf32>
    tpu.vector_store %arg13[%413, %c0_154], %412 {strides = array<i32>} : memref<16x32xf32, #tpu.memory_space<vmem>>, vector<2x32xf32>,
    %c8_i32_155 = arith.constant 8 : i32
    %c1_156 = arith.constant 1 : index
    %c0_157 = arith.constant 0 : index
    %c0_158 = arith.constant 0 : index
    %415 = vector.load %arg10[%c1_156, %c0_157, %c0_158] : memref<2x2x32xf32, #tpu.memory_space<vmem>>, vector<1x2x32xf32>
    %416 = vector.shape_cast %415 : vector<1x2x32xf32> to vector<2x32xf32>
    %417 = vector.shape_cast %412 : vector<2x32xf32> to vector<1x2x32xf32>
    tpu.vector_store %arg10[%c1_156, %c0_157, %c0_158], %417 {strides = array<i32>} : memref<2x2x32xf32, #tpu.memory_space<vmem>>, vector<1x2x32xf32>,
    %c1_159 = arith.constant 1 : index
    %c0_160 = arith.constant 0 : index
    %c0_161 = arith.constant 0 : index
    %418 = vector.load %arg11[%c1_159, %c0_160, %c0_161] : memref<2x2x32xf32, #tpu.memory_space<vmem>>, vector<1x2x32xf32>
    %419 = vector.shape_cast %418 : vector<1x2x32xf32> to vector<2x32xf32>
    %420 = vector.shape_cast %410 : vector<2x32xf32> to vector<1x2x32xf32>
    tpu.vector_store %arg11[%c1_159, %c0_160, %c0_161], %420 {strides = array<i32>} : memref<2x2x32xf32, #tpu.memory_space<vmem>>, vector<1x2x32xf32>,
    %c0_162 = arith.constant 0 : index
    %c0_163 = arith.constant 0 : index
    %421 = tpu.strided_load %arg13[%c0_162, %c0_163] {strides = array<i32: 2, 1>} : memref<16x32xf32, #tpu.memory_space<vmem>>, vector<8x32xf32>
    %c0_164 = arith.constant 0 : index
    %c0_165 = arith.constant 0 : index
    %c0_166 = arith.constant 0 : index
    %422 = vector.load %arg9[%c0_164, %c0_165, %c0_166] : memref<2x8x32xf32, #tpu.memory_space<vmem>>, vector<1x8x32xf32>
    %423 = vector.shape_cast %422 : vector<1x8x32xf32> to vector<8x32xf32>
    %424 = vector.shape_cast %421 : vector<8x32xf32> to vector<1x8x32xf32>
    tpu.vector_store %arg9[%c0_164, %c0_165, %c0_166], %424 {strides = array<i32>} : memref<2x8x32xf32, #tpu.memory_space<vmem>>, vector<1x8x32xf32>,
    %c1_167 = arith.constant 1 : index
    %c0_168 = arith.constant 0 : index
    %425 = tpu.strided_load %arg13[%c1_167, %c0_168] {strides = array<i32: 2, 1>} : memref<16x32xf32, #tpu.memory_space<vmem>>, vector<8x32xf32>
    %c1_169 = arith.constant 1 : index
    %c0_170 = arith.constant 0 : index
    %c0_171 = arith.constant 0 : index
    %426 = vector.load %arg9[%c1_169, %c0_170, %c0_171] : memref<2x8x32xf32, #tpu.memory_space<vmem>>, vector<1x8x32xf32>
    %427 = vector.shape_cast %426 : vector<1x8x32xf32> to vector<8x32xf32>
    %428 = vector.shape_cast %425 : vector<8x32xf32> to vector<1x8x32xf32>
    tpu.vector_store %arg9[%c1_169, %c0_170, %c0_171], %428 {strides = array<i32>} : memref<2x8x32xf32, #tpu.memory_space<vmem>>, vector<1x8x32xf32>,
    return
  }
  func.func @transform_0(%arg0: i32, %arg1: i32) -> (i32, i32) {
    %c1_i32 = arith.constant 1 : i32
    %0 = arith.muli %arg0, %c1_i32 : i32
    %1 = arith.addi %0, %arg1 : i32
    %c0_i32 = arith.constant 0 : i32
    %c0_i32_0 = arith.constant 0 : i32
    return %1, %c0_i32 : i32, i32
  }
  func.func @transform_1(%arg0: i32, %arg1: i32) -> (i32, i32) {
    %c0_i32 = arith.constant 0 : i32
    %c0_i32_0 = arith.constant 0 : i32
    %c0_i32_1 = arith.constant 0 : i32
    return %c0_i32, %c0_i32_0 : i32, i32
  }
  func.func @transform_2(%arg0: i32, %arg1: i32) -> (i32, i32) {
    %c0_i32 = arith.constant 0 : i32
    %c0_i32_0 = arith.constant 0 : i32
    %c0_i32_1 = arith.constant 0 : i32
    return %c0_i32, %c0_i32_0 : i32, i32
  }
  func.func @transform_3(%arg0: i32, %arg1: i32) -> (i32, i32) {
    %c0_i32 = arith.constant 0 : i32
    %c0_i32_0 = arith.constant 0 : i32
    %c0_i32_1 = arith.constant 0 : i32
    return %c0_i32, %c0_i32_0 : i32, i32
  }
  func.func @transform_4(%arg0: i32, %arg1: i32) -> (i32, i32) {
    %c0_i32 = arith.constant 0 : i32
    %c0_i32_0 = arith.constant 0 : i32
    %c0_i32_1 = arith.constant 0 : i32
    return %c0_i32, %c0_i32_0 : i32, i32
  }
  func.func @transform_5(%arg0: i32, %arg1: i32) -> (i32, i32) {
    %c0_i32 = arith.constant 0 : i32
    %c0_i32_0 = arith.constant 0 : i32
    %c0_i32_1 = arith.constant 0 : i32
    return %c0_i32, %c0_i32_0 : i32, i32
  }
  func.func @transform_6(%arg0: i32, %arg1: i32) -> (i32, i32) {
    %c0_i32 = arith.constant 0 : i32
    %c0_i32_0 = arith.constant 0 : i32
    %c0_i32_1 = arith.constant 0 : i32
    return %c0_i32, %c0_i32_0 : i32, i32
  }
  func.func @transform_7(%arg0: i32, %arg1: i32) -> (i32, i32, i32) {
    %c0_i32 = arith.constant 0 : i32
    %c0_i32_0 = arith.constant 0 : i32
    return %arg0, %arg1, %c0_i32 : i32, i32, i32
  }
  func.func @transform_8(%arg0: i32, %arg1: i32) -> (i32, i32, i32) {
    %c0_i32 = arith.constant 0 : i32
    %c0_i32_0 = arith.constant 0 : i32
    %c0_i32_1 = arith.constant 0 : i32
    return %c0_i32, %arg0, %c0_i32_0 : i32, i32, i32
  }
  func.func @transform_9(%arg0: i32, %arg1: i32) -> (i32, i32, i32) {
    %c0_i32 = arith.constant 0 : i32
    %c0_i32_0 = arith.constant 0 : i32
    %c0_i32_1 = arith.constant 0 : i32
    return %c0_i32, %arg0, %c0_i32_0 : i32, i32, i32
  }
}

</mosaic_0001>

<bundles_post_ra>
// kernel: code_gpt_forward.4
= control target key start
LH: loop header
LB: loop body
LE: loop exit
PB: predicated region body
PF: predicated region fallthrough
CT: control target
= control target key end

     0   :  { %vm18_vm0 = vcmask 80896   ;;  %v89_v2 = vmov 0.0   ;;  %vm29_vm1 = vcmask 261120   ;;  %s143_s1 = inlined_call_operand.vmem [shape: f32[32,10], index: 1, kind: input, shape index: {}]   ;;  %s144_s2 = inlined_call_operand.vmem [shape: f32[1,10], index: 2, kind: input, shape index: {}]   ;;  %s145_s0 = inlined_call_operand.vmem [shape: f32[16,32], index: 0, kind: input, shape index: {}]   ;;  %s146_s3 = inlined_call_operand.vmem [shape: f32[16,10], index: 3, kind: output, shape index: {}]  }
   0x1   :  { %v28_v0 = vld [vmem:[%s143_s1 + $0x18] sm:$0xff]  ;;  %v27_v1 = vld [vmem:[%s143_s1 + $0x10] sm:$0xff]  ;;  %19 = vst.msk [vmem:[#allocation2] sm:$0xff] %vm18_vm0, %v89_v2  ;;  %v26_v3 = vld [vmem:[%s143_s1 + $0x8] sm:$0xff] }
   0x2   :  { %48 = vmatpush.msra.mxu0 %v28_v0  ;;  %83 = vmatpush.msra.mxu1 %v28_v0  ;;  %20 = vst.msk [vmem:[#allocation2 + $0x8] sm:$0xff] %vm18_vm0, %v89_v2  ;;  %v25_v4 = vld [vmem:[%s143_s1] sm:$0xff]  ;;  %v24_v6 = vld [vmem:[%s145_s0 + $0x8] sm:$0xff] }
   0x3   :  { %v23_v5 = vld [vmem:[%s145_s0] sm:$0xff] }
   0x4   :  { %49 = vmatpush.msra.mxu0 %v27_v1  ;;  %84 = vmatpush.msra.mxu1 %v27_v1  ;;  %v88_v13 = vld [vmem:[%s144_s2] ss:$0 sm:$0xff] }
   0x6   :  { %50 = vmatpush.msra.mxu0 %v26_v3  ;;  %85 = vmatpush.msra.mxu1 %v26_v3 }
   0x8   :  { %51 = vmatpush.msra.mxu0 %v25_v4  ;;  %86 = vmatpush.msra.mxu1 %v25_v4  ;;  %v21_v7 = vld [vmem:[#allocation2] sm:$0xff] }
   0x9   :  { %81 = vmatmul.msk.f32.vlgmr.msra.gmra.mxu0 %vm29_vm1, %v23_v5  ;;  %82 = vmatmul.msk.f32.vlgmr.msra.gmra.mxu1 %vm29_vm1, %v24_v6  ;;  %v22_v8 = vld [vmem:[#allocation2 + $0x8] sm:$0xff] }
  0x86   :  { %v53_v9 = vpop.f32.mrf.mxu0  ;;  %v56_v10 = vpop.f32.mrf.mxu1 }
  0x87   :  { %v59_v11 = vadd.f32 %v53_v9, %v21_v7  ;;  %v60_v12 = vadd.f32 %v56_v10, %v22_v8 }
  0x89   :  { %62 = vst.msk [vmem:[#allocation2] sm:$0xff] %vm18_vm0, %v59_v11 }
  0x8a   :  { %63 = vst.msk [vmem:[#allocation2 + $0x8] sm:$0xff] %vm18_vm0, %v60_v12 }
  0x90   :  { %v67_v14 = vld [vmem:[#allocation2] sm:$0xff] }
  0x91   :  { %v73_v15 = vadd.f32 %v88_v13, %v67_v14  ;;  %v68_v16 = vld [vmem:[#allocation2 + $0x8] sm:$0xff] }
  0x92   :  { %v74_v17 = vadd.f32 %v88_v13, %v68_v16 }
  0x93   :  { %75 = vst.msk [vmem:[%s146_s3] sm:$0xff] %vm18_vm0, %v73_v15 }
  0x94   :  { %76 = vst.msk [vmem:[%s146_s3 + $0x8] sm:$0xff] %vm18_vm0, %v74_v17 }

// kernel: code_gpt_forward.5
= control target key start
LH: loop header
LB: loop body
LE: loop exit
PB: predicated region body
PF: predicated region fallthrough
CT: control target
= control target key end

     0   :  { %vm35_vm0 = vcmask 1041408   ;;  %vm28_vm1 = vcmask 80896   ;;  %vm19_vm2 = vcmask 244736   ;;  %s182_s0 = inlined_call_operand.vmem [shape: f32[16,10], index: 0, kind: input, shape index: {}]   ;;  %s183_s1 = inlined_call_operand.vmem [shape: f32[10,30], index: 1, kind: input, shape index: {}]   ;;  %s184_s2 = inlined_call_operand.vmem [shape: f32[1,30], index: 2, kind: input, shape index: {}]   ;;  %s185_s3 = inlined_call_operand.hbm [shape: f32[16,30], index: 3, kind: output, shape index: {}]  }
   0x1   :  { %v27_v0 = vld [vmem:[%s183_s1 + $0x8] sm:$0x3]  ;;  %v26_v1 = vld [vmem:[%s183_s1] sm:$0xff] }
   0x2   :  { %v24_v2 = vld [vmem:[%s182_s0] sm:$0xff]  ;;  %98 = vmatpush.msk.msra.mxu0 %vm35_vm0, %v27_v0  ;;  %101 = vmatpush.msk.msra.mxu1 %vm35_vm0, %v27_v0  ;;  %v25_v3 = vld [vmem:[%s182_s0 + $0x8] sm:$0xff] }
   0x3   :  { %8 = vsyncpa [#allocation4], 0  ;;  %v134_v4 = vmov 0.0   ;;  %v107_v11 = vld [vmem:[%s184_s2] ss:$0 sm:$0xff]  ;;  %s135_s20 = smov [#allocation3]  }
   0x4   :  { %20 = vst.msk [vmem:[#allocation2] sm:$0xff] %vm19_vm2, %v134_v4  ;;  %54 = vmatpush.msra.mxu0 %v26_v1  ;;  %102 = vmatpush.msra.mxu1 %v26_v1  ;;  %s84_s21 = sshll.u32 %s135_s20, 4  ;;  %s86_s24 = sshll.u32 %s185_s3, 4  ;;  %s85_s21 = int_to_ptr.vmem [resolvable:$true] %s84_s21  ;;  %s87_s24 = int_to_ptr.hbm [resolvable:$true] %s86_s24 }
   0x5   :  { %21 = vst.msk [vmem:[#allocation2 + $0x8] sm:$0xff] %vm19_vm2, %v134_v4  ;;  %99 = vmatmul.msk.f32.vlgmr.msra.gmra.mxu0 %vm28_vm1, %v24_v2  ;;  %100 = vmatmul.msk.f32.vlgmr.msra.gmra.mxu1 %vm28_vm1, %v25_v3  ;;  %s136_s25 = smov 128   ;;  %s137_s26 = smov 8  }
   0xb   :  { %v22_v5 = vld [vmem:[#allocation2] sm:$0xff] }
   0xc   :  { %v23_v6 = vld [vmem:[#allocation2 + $0x8] sm:$0xff] }
  0x82   :  { %v56_v7 = vpop.f32.mrf.mxu0  ;;  %v59_v8 = vpop.f32.mrf.mxu1 }
  0x83   :  { %v62_v9 = vadd.f32 %v56_v7, %v22_v5  ;;  %v63_v10 = vadd.f32 %v59_v8, %v23_v6 }
  0x85   :  { %65 = vst.msk [vmem:[#allocation2] sm:$0xff] %vm19_vm2, %v62_v9 }
  0x86   :  { %66 = vst.msk [vmem:[#allocation2 + $0x8] sm:$0xff] %vm19_vm2, %v63_v10 }
  0x8c   :  { %v70_v12 = vld [vmem:[#allocation2] sm:$0xff] }
  0x8d   :  { %v71_v13 = vld [vmem:[#allocation2 + $0x8] sm:$0xff]  ;;  %v76_v14 = vadd.f32 %v107_v11, %v70_v12 }
  0x8e   :  { %v77_v15 = vadd.f32 %v107_v11, %v71_v13 }
  0x8f   :  { %78 = vst.msk [vmem:[#allocation3] sm:$0xff] %vm19_vm2, %v76_v14 }
  0x90   :  { %79 = vst.msk [vmem:[#allocation3 + $0x8] sm:$0xff] %vm19_vm2, %v77_v15 }
  0x91   :  { %92 = dma.vmem_to_hbm [thread:$0]  %s85_s21, 256, %s87_s24, [#allocation4], %s136_s25, %s136_s25, %s137_s26  }
  0x92   :  { %132 = dma.done.wait [#allocation4], 256  }
  0x93   :  { %133 = vsyncadd [#allocation4], 4294967040 }
  0x94   :  { %97 = vsyncpa [#allocation4], 1 }

// kernel: code_gpt_forward.3
= control target key start
LH: loop header
LB: loop body
LE: loop exit
PB: predicated region body
PF: predicated region fallthrough
CT: control target
= control target key end

     0   :  { %15 = vsyncpa [#allocation5], 0  ;;  %vm57_vm0 = vcmask 254976   ;;  %vm70_vm1 = vcmask 130048   ;;  %v1571_v5 = vmov 0.0   ;;  %s1882_s0 = inlined_call_operand.vmem [shape: f32[16,16], index: 0, kind: input, shape index: {}]   ;;  %s1883_s1 = inlined_call_operand.vmem [shape: f32[16,128], index: 1, kind: input, shape index: {}]   ;;  %s1884_s2 = inlined_call_operand.vmem [shape: f32[32,128], index: 2, kind: input, shape index: {}]   ;;  %s1885_s3 = inlined_call_operand.vmem [shape: f32[1,128], index: 3, kind: input, shape index: {}]   ;;  %s1886_s4 = inlined_call_operand.vmem [shape: f32[32,128], index: 4, kind: input, shape index: {}]   ;;  %s1887_s5 = inlined_call_operand.vmem [shape: f32[32,128], index: 5, kind: input, shape index: {}]   ;;  %s1888_s6 = inlined_call_operand.vmem [shape: f32[1,128], index: 6, kind: input, shape index: {}]   ;;  %s1889_s7 = inlined_call_operand.vmem [shape: f32[2,8,32], index: 7, kind: output, shape index: {0}]   ;;  %s1890_s8 = inlined_call_operand.hbm [shape: f32[2,2,32], index: 8, kind: output, shape index: {1}]   ;;  %s1891_s9 = inlined_call_operand.hbm [shape: f32[2,2,32], index: 9, kind: output, shape index: {2}]  }
   0x1   :  { %v65_v0 = vld [vmem:[%s1883_s1 + $0x8] sm:$0xff]  ;;  %v64_v1 = vld [vmem:[%s1883_s1] sm:$0xff]  ;;  %v108_v3 = vld [vmem:[%s1884_s2 + $0x18] sm:$0xff]  ;;  %58 = vst.msk [vmem:[#allocation4] sm:$0x3] %vm57_vm0, %v1571_v5 }
   0x2   :  { %91 = vmatpush.msra.mxu0 %v65_v0  ;;  %v62_v2 = vld [vmem:[%s1882_s0] sm:$0xff]  ;;  %v107_v4 = vld [vmem:[%s1884_s2 + $0x10] sm:$0xff]  ;;  %125 = vmatpush.msra.mxu1 %v108_v3  ;;  %59 = vst.msk [vmem:[#allocation4 + $0x2] sm:$0x3] %vm57_vm0, %v1571_v5  ;;  %v106_v6 = vld [vmem:[%s1884_s2 + $0x8] sm:$0xff] }
   0x3   :  { %200 = vmatpush.msra.mxu2 %v108_v3  ;;  %60 = vst.msk [vmem:[#allocation6] sm:$0x3] %vm57_vm0, %v1571_v5  ;;  %270 = vmatpush.msra.mxu3 %v108_v3 }
   0x4   :  { %92 = vmatpush.msra.mxu0 %v64_v1  ;;  %126 = vmatpush.msra.mxu1 %v107_v4  ;;  %61 = vst.msk [vmem:[#allocation6 + $0x2] sm:$0x3] %vm57_vm0, %v1571_v5 }
   0x5   :  { %1345 = vmatmul.msk.f32.vlgmr.msra.gmra.mxu0 %vm70_vm1, %v62_v2 }
   0x6   :  { %16 = vsyncpa [#allocation7], 0  ;;  %v105_v7 = vld [vmem:[%s1884_s2] sm:$0xff]  ;;  %201 = vmatpush.msra.mxu2 %v107_v4  ;;  %271 = vmatpush.msra.mxu3 %v107_v4  ;;  %vm109_vm2 = vcmask 261120   ;;  %s1572_s23 = smov 32   ;;  %s1575_s19 = smov [#allocation6]  }
   0x7   :  { %127 = vmatpush.msra.mxu1 %v106_v6  ;;  %550 = vmatpush.msrb.mxu0 %v108_v3  ;;  %v1658_v9 = vld [vmem:[%s1885_s3] ss:$0 sm:$0xff]  ;;  %s1573_s3 = smov 64   ;;  %s1318_s20 = sshll.u32 %s1575_s19, 4  ;;  %s1319_s20 = int_to_ptr.vmem [resolvable:$true] %s1318_s20 }
   0x8   :  { %202 = vmatpush.msra.mxu2 %v106_v6  ;;  %272 = vmatpush.msra.mxu3 %v106_v6  ;;  %v102_v8 = vld [vmem:[#allocation4] sm:$0x3]  ;;  %s1320_s22 = sshll.u32 %s1891_s9, 4  ;;  %s1576_s24 = smov 2   ;;  %s1321_s22 = int_to_ptr.hbm [resolvable:$true] %s1320_s22 }
   0x9   :  { %128 = vmatpush.msra.mxu1 %v105_v7  ;;  %551 = vmatpush.msrb.mxu0 %v107_v4  ;;  %s1577_s25 = smov [#allocation4]  }
   0xa   :  { %1347 = vmatmul.msk.f32.vlgmr.msra.gmra.mxu1 %vm109_vm2, %v102_v8  ;;  %203 = vmatpush.msra.mxu2 %v105_v7  ;;  %v103_v16 = vld [vmem:[#allocation6] sm:$0x3]  ;;  %s1305_s26 = sshll.u32 %s1577_s25, 4  ;;  %s1306_s26 = int_to_ptr.vmem [resolvable:$true] %s1305_s26 }
   0xb   :  { %273 = vmatpush.msra.mxu3 %v105_v7  ;;  %340 = vmatpush.msrb.mxu1 %v108_v3 }
   0xc   :  { %410 = vmatpush.msrb.mxu2 %v108_v3  ;;  %552 = vmatpush.msrb.mxu0 %v106_v6 }
   0xd   :  { %480 = vmatpush.msrb.mxu3 %v108_v3  ;;  %341 = vmatpush.msrb.mxu1 %v107_v4 }
   0xe   :  { %411 = vmatpush.msrb.mxu2 %v107_v4  ;;  %553 = vmatpush.msrb.mxu0 %v105_v7 }
   0xf   :  { %481 = vmatpush.msrb.mxu3 %v107_v4  ;;  %342 = vmatpush.msrb.mxu1 %v106_v6 }
  0x10   :  { %412 = vmatpush.msrb.mxu2 %v106_v6 }
  0x11   :  { %482 = vmatpush.msrb.mxu3 %v106_v6  ;;  %343 = vmatpush.msrb.mxu1 %v105_v7 }
  0x12   :  { %413 = vmatpush.msrb.mxu2 %v105_v7 }
  0x13   :  { %483 = vmatpush.msrb.mxu3 %v105_v7  ;;  %620 = vmatpush.msra.mxu1 %v108_v3 }
  0x15   :  { %621 = vmatpush.msra.mxu1 %v107_v4 }
  0x17   :  { %622 = vmatpush.msra.mxu1 %v106_v6 }
  0x19   :  { %623 = vmatpush.msra.mxu1 %v105_v7 }
  0x82   :  { %v94_v10 = vpop.f32.mrf.mxu0 }
  0x83   :  { %v95_v11 = vadd.f32 %v1658_v9, %v94_v10 }
  0x85   :  { %100 = vst [vmem:[#allocation2] sm:$0xff] %v95_v11 }
  0x87   :  { %v130_v12 = vpop.f32.mrf.mxu1 }
  0x8c   :  { %v104_v13 = vld [vmem:[#allocation2] sm:$0x3]  ;;  %v181_v40 = vld [vmem:[#allocation2 + $0x2] sm:$0x3]  ;;  %v251_v2 = vld [vmem:[#allocation2 + $0x4] sm:$0x3] }
  0x8d   :  { %v133_v14 = vadd.f32 %v130_v12, %v104_v13 }
  0x8f   :  { %1391 = vtanh.f32 %v133_v14  ;;  %v1348_v17 = vmul.f32 -1.442695, %v133_v14 }
  0x91   :  { %1393 = vpow2.f32 %v1348_v17 }
  0x95   :  { %v1392_v15 = vpop.eup %1391 }
  0x96   :  { %160 = vrot.lane.b32.xlu0 %v1392_v15, %s1572_s23 }
  0x97   :  { %v1394_v18 = vpop.eup %1393 }
  0x98   :  { %v137_v19 = vadd.f32 1.0, %v1394_v18 }
  0x9a   :  { %1395 = vrcp.f32 %v137_v19  ;;  %v149_v25 = vand.u32 2147483648, %v137_v19  ;;  %vm143_vm4 = vweird.f32 %v137_v19  ;;  %v147_v26 = vand.u32 2147483647, %v137_v19 }
  0x9c   :  { %v150_v28 = vor.u32 1.1754944e-38, %v149_v25  ;;  %vm148_vm6 = vcmp.eq.f32.partialorder %v147_v26, 8.507059e+37 }
  0x9e   :  { %155 = vrot.lane.b32.xlu0 %v103_v16, %s1572_s23 }
  0xa0   :  { %v1396_v20 = vpop.eup %1395 }
  0xa1   :  { %v139_v21 = vmul.f32 %v1396_v20, %v137_v19  ;;  %vm144_vm3 = vweird.f32 %v1396_v20 }
  0xa2   :  { %vm145_vm5 = vmor %vm143_vm4, %vm144_vm3 }
  0xa3   :  { %v140_v22 = vsub.f32 1.0, %v139_v21 }
  0xa5   :  { %v141_v23 = vmul.f32 %v1396_v20, %v140_v22 }
  0xa7   :  { %v142_v24 = vadd.f32 %v1396_v20, %v141_v23 }
  0xa9   :  { %v146_v27 = vsel %vm145_vm5, %v1396_v20, %v142_v24 }
  0xaa   :  { %v151_v30 = vsel %vm148_vm6, %v150_v28, %v146_v27 }
 0x108   :  { %v161_v29 = vpop.permute.xlu0 %160 }
 0x109   :  { %v163_v31 = vmul.f32 %v161_v29, %v151_v30  ;;  %v321_v29 = vld [vmem:[#allocation2 + $0x6] sm:$0x3] }
 0x10b   :  { %165 = vrot.lane.b32.xlu1 %v163_v31, %s1572_s23 }
 0x110   :  { %v156_v32 = vpop.permute.xlu0 %155 }
 0x111   :  { %v158_v33 = vmul.f32 %v156_v32, %v151_v30 }
 0x17d   :  { %v166_v34 = vpop.permute.xlu1 %165 }
 0x17e   :  { %v168_v35 = vadd.f32 %v166_v34, %v158_v33 }
 0x180   :  { %1397 = vtanh.f32 %v168_v35 }
 0x186   :  { %v1398_v36 = vpop.eup %1397 }
 0x187   :  { %171 = vrot.lane.b32.xlu1 %v1398_v36, %s1572_s23 }
 0x1f9   :  { %v172_v37 = vpop.permute.xlu1 %171 }
 0x1fa   :  { %v174_v38 = vmul.f32 %v172_v37, %v151_v30 }
 0x1fc   :  { %176 = vrot.lane.b32.xlu2 %v174_v38, %s1573_s3 }
 0x256   :  { %v177_v39 = vpop.permute.xlu2 %176 }
 0x257   :  { %180 = vst.msk [vmem:[#allocation3] sm:$0x3] %vm57_vm0, %v177_v39  ;;  %1349 = vmatmul.msk.f32.vlgmr.msra.gmra.mxu2 %vm109_vm2, %v177_v39 }
 0x2da   :  { %v205_v41 = vpop.f32.mrf.mxu2 }
 0x2db   :  { %v208_v42 = vadd.f32 %v205_v41, %v181_v40 }
 0x2dd   :  { %1399 = vtanh.f32 %v208_v42  ;;  %v1350_v44 = vmul.f32 -1.442695, %v208_v42 }
 0x2df   :  { %1401 = vpow2.f32 %v1350_v44 }
 0x2e3   :  { %v1400_v43 = vpop.eup %1399 }
 0x2e4   :  { %231 = vrot.lane.b32.xlu2 %v1400_v43, %s1572_s23 }
 0x2e5   :  { %v1402_v45 = vpop.eup %1401 }
 0x2e6   :  { %v212_v46 = vadd.f32 1.0, %v1402_v45 }
 0x2e8   :  { %1403 = vrcp.f32 %v212_v46  ;;  %v224_v52 = vand.u32 2147483648, %v212_v46  ;;  %vm218_vm8 = vweird.f32 %v212_v46  ;;  %v222_v53 = vand.u32 2147483647, %v212_v46 }
 0x2ea   :  { %v225_v55 = vor.u32 1.1754944e-38, %v224_v52  ;;  %vm223_vm10 = vcmp.eq.f32.partialorder %v222_v53, 8.507059e+37  ;;  %v63_v52 = vld [vmem:[%s1882_s0 + $0x8] sm:$0xff] }
 0x2eb   :  { %1346 = vmatmul.msk.f32.gmra.mxu0 %vm70_vm1, %v63_v52 }
 0x2ee   :  { %v1404_v47 = vpop.eup %1403 }
 0x2ef   :  { %v214_v48 = vmul.f32 %v1404_v47, %v212_v46  ;;  %vm219_vm7 = vweird.f32 %v1404_v47 }
 0x2f0   :  { %vm220_vm9 = vmor %vm218_vm8, %vm219_vm7 }
 0x2f1   :  { %v215_v49 = vsub.f32 1.0, %v214_v48 }
 0x2f3   :  { %v216_v50 = vmul.f32 %v1404_v47, %v215_v49 }
 0x2f5   :  { %v217_v51 = vadd.f32 %v1404_v47, %v216_v50 }
 0x2f7   :  { %v221_v54 = vsel %vm220_vm9, %v1404_v47, %v217_v51 }
 0x2f8   :  { %v226_v57 = vsel %vm223_vm10, %v225_v55, %v221_v54  ;;  %v682_v55 = vld [vmem:[%s1886_s4 + $0x18] sm:$0xff] }
 0x2f9   :  { %v229_v59 = vmul.f32 %v226_v57, %v168_v35  ;;  %705 = vmatpush.msra.mxu2 %v682_v55 }
 0x33e   :  { %v232_v56 = vpop.permute.xlu2 %231 }
 0x33f   :  { %v234_v58 = vmul.f32 %v232_v56, %v226_v57  ;;  %v681_v56 = vld [vmem:[%s1886_s4 + $0x10] sm:$0xff] }
 0x340   :  { %706 = vmatpush.msra.mxu2 %v681_v56 }
 0x341   :  { %236 = vrot.lane.b32.xlu0 %v234_v58, %s1572_s23  ;;  %v679_v58 = vld [vmem:[%s1886_s4] sm:$0xff] }
 0x3b3   :  { %v237_v60 = vpop.permute.xlu0 %236 }
 0x3b4   :  { %v239_v61 = vadd.f32 %v237_v60, %v229_v59  ;;  %v97_v59 = vpop.f32.mrf.mxu0 }
 0x3b5   :  { %v98_v60 = vadd.f32 %v1658_v9, %v97_v59 }
 0x3b6   :  { %1405 = vtanh.f32 %v239_v61 }
 0x3b7   :  { %101 = vst [vmem:[#allocation2 + $0x8] sm:$0xff] %v98_v60 }
 0x3bc   :  { %v1406_v62 = vpop.eup %1405 }
 0x3bd   :  { %242 = vrot.lane.b32.xlu1 %v1406_v62, %s1572_s23 }
 0x42f   :  { %v243_v63 = vpop.permute.xlu1 %242 }
 0x430   :  { %v245_v0 = vmul.f32 %v243_v63, %v226_v57  ;;  %v680_v57 = vld [vmem:[%s1886_s4 + $0x8] sm:$0xff] }
 0x431   :  { %707 = vmatpush.msra.mxu2 %v680_v57  ;;  %v391_v63 = vld [vmem:[#allocation2 + $0x8] sm:$0x3] }
 0x432   :  { %247 = vrot.lane.b32.xlu2 %v245_v0, %s1573_s3 }
 0x433   :  { %708 = vmatpush.msra.mxu2 %v679_v58 }
 0x48c   :  { %v248_v1 = vpop.permute.xlu2 %247 }
 0x48d   :  { %250 = vst.msk [vmem:[#allocation3 + $0x2] sm:$0x3] %vm57_vm0, %v248_v1  ;;  %1351 = vmatmul.msk.f32.vlgmr.msra.gmra.mxu3 %vm109_vm2, %v248_v1 }
 0x510   :  { %v275_v3 = vpop.f32.mrf.mxu3 }
 0x511   :  { %v278_v4 = vadd.f32 %v275_v3, %v251_v2  ;;  %v1707_v2 = vld [vmem:[%s1888_s6] ss:$0 sm:$0xff] }
 0x513   :  { %1407 = vtanh.f32 %v278_v4  ;;  %v1352_v6 = vmul.f32 -1.442695, %v278_v4 }
 0x515   :  { %1409 = vpow2.f32 %v1352_v6 }
 0x519   :  { %v1408_v5 = vpop.eup %1407 }
 0x51a   :  { %301 = vrot.lane.b32.xlu0 %v1408_v5, %s1572_s23 }
 0x51b   :  { %v1410_v7 = vpop.eup %1409 }
 0x51c   :  { %v282_v8 = vadd.f32 1.0, %v1410_v7 }
 0x51e   :  { %1411 = vrcp.f32 %v282_v8  ;;  %v294_v15 = vand.u32 2147483648, %v282_v8  ;;  %vm288_vm12 = vweird.f32 %v282_v8  ;;  %v292_v16 = vand.u32 2147483647, %v282_v8 }
 0x520   :  { %v295_v18 = vor.u32 1.1754944e-38, %v294_v15  ;;  %vm293_vm14 = vcmp.eq.f32.partialorder %v292_v16, 8.507059e+37 }
 0x524   :  { %v1412_v10 = vpop.eup %1411 }
 0x525   :  { %v284_v11 = vmul.f32 %v1412_v10, %v282_v8  ;;  %vm289_vm11 = vweird.f32 %v1412_v10 }
 0x526   :  { %vm290_vm13 = vmor %vm288_vm12, %vm289_vm11 }
 0x527   :  { %v285_v12 = vsub.f32 1.0, %v284_v11 }
 0x529   :  { %v286_v13 = vmul.f32 %v1412_v10, %v285_v12 }
 0x52b   :  { %v287_v14 = vadd.f32 %v1412_v10, %v286_v13 }
 0x52d   :  { %v291_v17 = vsel %vm290_vm13, %v1412_v10, %v287_v14 }
 0x52e   :  { %v296_v20 = vsel %vm293_vm14, %v295_v18, %v291_v17 }
 0x52f   :  { %v299_v22 = vmul.f32 %v296_v20, %v239_v61 }
 0x58c   :  { %v302_v19 = vpop.permute.xlu0 %301 }
 0x58d   :  { %v304_v21 = vmul.f32 %v302_v19, %v296_v20 }
 0x58f   :  { %306 = vrot.lane.b32.xlu1 %v304_v21, %s1572_s23 }
 0x601   :  { %v307_v23 = vpop.permute.xlu1 %306 }
 0x602   :  { %v309_v24 = vadd.f32 %v307_v23, %v299_v22 }
 0x604   :  { %1413 = vtanh.f32 %v309_v24 }
 0x60a   :  { %v1414_v25 = vpop.eup %1413 }
 0x60b   :  { %312 = vrot.lane.b32.xlu2 %v1414_v25, %s1572_s23 }
 0x665   :  { %v313_v26 = vpop.permute.xlu2 %312 }
 0x666   :  { %v315_v27 = vmul.f32 %v313_v26, %v296_v20 }
 0x668   :  { %317 = vrot.lane.b32.xlu0 %v315_v27, %s1573_s3  ;;  %v1720_v27 = vld [vmem:[%s1887_s5 + $0x18] sm:$0xff] }
 0x669   :  { %742 = vmatpush.msra.mxu3 %v1720_v27  ;;  %816 = vmatpush.msra.mxu0 %v1720_v27 }
 0x6da   :  { %v318_v28 = vpop.permute.xlu0 %317 }
 0x6db   :  { %320 = vst.msk [vmem:[#allocation3 + $0x4] sm:$0x3] %vm57_vm0, %v318_v28  ;;  %1353 = vmatmul.msk.f32.vlgmr.msrb.gmra.mxu1 %vm109_vm2, %v318_v28  ;;  %v1725_v28 = vld [vmem:[%s1887_s5 + $0x10] sm:$0xff] }
 0x6dc   :  { %886 = vmatpush.msrb.mxu1 %v1720_v27  ;;  %743 = vmatpush.msra.mxu3 %v1725_v28 }
 0x6dd   :  { %817 = vmatpush.msra.mxu0 %v1725_v28 }
 0x6de   :  { %887 = vmatpush.msrb.mxu1 %v1725_v28 }
 0x758   :  { %v345_v30 = vpop.f32.mrf.mxu1 }
 0x759   :  { %v348_v31 = vadd.f32 %v345_v30, %v321_v29  ;;  %v1732_v29 = vld [vmem:[%s1887_s5 + $0x8] sm:$0xff]  ;;  %v1741_v30 = vld [vmem:[%s1887_s5] sm:$0xff]  ;;  %s1574_s5 = smov 96  }
 0x75a   :  { %744 = vmatpush.msra.mxu3 %v1732_v29  ;;  %818 = vmatpush.msra.mxu0 %v1732_v29 }
 0x75b   :  { %1415 = vtanh.f32 %v348_v31  ;;  %v1354_v33 = vmul.f32 -1.442695, %v348_v31  ;;  %888 = vmatpush.msrb.mxu1 %v1732_v29 }
 0x75c   :  { %745 = vmatpush.msra.mxu3 %v1741_v30  ;;  %819 = vmatpush.msra.mxu0 %v1741_v30 }
 0x75d   :  { %1417 = vpow2.f32 %v1354_v33  ;;  %889 = vmatpush.msrb.mxu1 %v1741_v30  ;;  %v461_v33 = vld [vmem:[#allocation2 + $0xa] sm:$0x3] }
 0x761   :  { %v1416_v32 = vpop.eup %1415 }
 0x762   :  { %371 = vrot.lane.b32.xlu1 %v1416_v32, %s1572_s23  ;;  %v719_v32 = vld [vmem:[#allocation4 + $0x2] sm:$0x3] }
 0x763   :  { %v1418_v34 = vpop.eup %1417 }
 0x764   :  { %v352_v35 = vadd.f32 1.0, %v1418_v34 }
 0x766   :  { %1419 = vrcp.f32 %v352_v35  ;;  %v364_v41 = vand.u32 2147483648, %v352_v35  ;;  %vm358_vm3 = vweird.f32 %v352_v35  ;;  %v362_v42 = vand.u32 2147483647, %v352_v35 }
 0x768   :  { %v365_v44 = vor.u32 1.1754944e-38, %v364_v41  ;;  %vm363_vm5 = vcmp.eq.f32.partialorder %v362_v42, 8.507059e+37 }
 0x76c   :  { %v1420_v36 = vpop.eup %1419 }
 0x76d   :  { %v354_v37 = vmul.f32 %v1420_v36, %v352_v35  ;;  %vm359_vm15 = vweird.f32 %v1420_v36 }
 0x76e   :  { %vm360_vm4 = vmor %vm358_vm3, %vm359_vm15 }
 0x76f   :  { %v355_v38 = vsub.f32 1.0, %v354_v37 }
 0x771   :  { %v356_v39 = vmul.f32 %v1420_v36, %v355_v38 }
 0x773   :  { %v357_v40 = vadd.f32 %v1420_v36, %v356_v39 }
 0x775   :  { %v361_v43 = vsel %vm360_vm4, %v1420_v36, %v357_v40  ;;  %v721_v40 = vld [vmem:[#allocation6 + $0x2] sm:$0x3] }
 0x776   :  { %v366_v46 = vsel %vm363_vm5, %v365_v44, %v361_v43 }
 0x777   :  { %v369_v48 = vmul.f32 %v366_v46, %v309_v24 }
 0x7d4   :  { %v372_v45 = vpop.permute.xlu1 %371 }
 0x7d5   :  { %v374_v47 = vmul.f32 %v372_v45, %v366_v46 }
 0x7d7   :  { %376 = vrot.lane.b32.xlu2 %v374_v47, %s1572_s23 }
 0x831   :  { %v377_v49 = vpop.permute.xlu2 %376 }
 0x832   :  { %v379_v50 = vadd.f32 %v377_v49, %v369_v48 }
 0x834   :  { %1421 = vtanh.f32 %v379_v50 }
 0x83a   :  { %v1422_v51 = vpop.eup %1421 }
 0x83b   :  { %382 = vrot.lane.b32.xlu0 %v1422_v51, %s1572_s23 }
 0x8ad   :  { %v383_v53 = vpop.permute.xlu0 %382 }
 0x8ae   :  { %v385_v54 = vmul.f32 %v383_v53, %v366_v46 }
 0x8b0   :  { %387 = vrot.lane.b32.xlu1 %v385_v54, %s1573_s3 }
 0x922   :  { %v388_v61 = vpop.permute.xlu1 %387 }
 0x923   :  { %390 = vst.msk [vmem:[#allocation3 + $0x6] sm:$0x3] %vm57_vm0, %v388_v61  ;;  %1355 = vmatmul.msk.f32.vlgmr.msrb.gmra.mxu2 %vm109_vm2, %v388_v61 }
 0x924   :  { %1166 = vmatpush.msrb.mxu2 %v1720_v27 }
 0x926   :  { %1167 = vmatpush.msrb.mxu2 %v1725_v28 }
 0x928   :  { %1168 = vmatpush.msrb.mxu2 %v1732_v29 }
 0x92a   :  { %v677_v62 = vld [vmem:[#allocation3] sm:$0xff]  ;;  %1169 = vmatpush.msrb.mxu2 %v1741_v30 }
 0x92b   :  { %1363 = vmatmul.msk.f32.vlgmr.msra.gmra.mxu2 %vm109_vm2, %v677_v62 }
 0x9a6   :  { %v415_v0 = vpop.f32.mrf.mxu2 }
 0x9a7   :  { %v418_v1 = vadd.f32 %v415_v0, %v391_v63 }
 0x9a9   :  { %1423 = vtanh.f32 %v418_v1  ;;  %v1356_v5 = vmul.f32 -1.442695, %v418_v1 }
 0x9ab   :  { %1425 = vpow2.f32 %v1356_v5 }
 0x9ae   :  { %v710_v3 = vpop.f32.mrf.mxu2 }
 0x9af   :  { %v1424_v9 = vpop.eup %1423  ;;  %v711_v4 = vadd.f32 %v1707_v2, %v710_v3 }
 0x9b0   :  { %441 = vrot.lane.b32.xlu2 %v1424_v9, %s1572_s23 }
 0x9b1   :  { %716 = vst [vmem:[#allocation2] sm:$0xff] %v711_v4  ;;  %v1426_v6 = vpop.eup %1425 }
 0x9b2   :  { %v422_v7 = vadd.f32 1.0, %v1426_v6 }
 0x9b4   :  { %1427 = vrcp.f32 %v422_v7  ;;  %v434_v14 = vand.u32 2147483648, %v422_v7  ;;  %vm428_vm6 = vweird.f32 %v422_v7  ;;  %v432_v15 = vand.u32 2147483647, %v422_v7 }
 0x9b6   :  { %v435_v17 = vor.u32 1.1754944e-38, %v434_v14  ;;  %vm433_vm8 = vcmp.eq.f32.partialorder %v432_v15, 8.507059e+37 }
 0x9b8   :  { %v722_v36 = vld [vmem:[#allocation2] sm:$0x3] }
 0x9ba   :  { %v1428_v8 = vpop.eup %1427 }
 0x9bb   :  { %v424_v10 = vmul.f32 %v1428_v8, %v422_v7  ;;  %vm429_vm1 = vweird.f32 %v1428_v8 }
 0x9bc   :  { %vm430_vm7 = vmor %vm428_vm6, %vm429_vm1 }
 0x9bd   :  { %v425_v11 = vsub.f32 1.0, %v424_v10 }
 0x9bf   :  { %v426_v12 = vmul.f32 %v1428_v8, %v425_v11 }
 0x9c1   :  { %v427_v13 = vadd.f32 %v1428_v8, %v426_v12 }
 0x9c3   :  { %v431_v16 = vsel %vm430_vm7, %v1428_v8, %v427_v13 }
 0x9c4   :  { %v436_v19 = vsel %vm433_vm8, %v435_v17, %v431_v16 }
 0x9c5   :  { %v439_v21 = vmul.f32 %v436_v19, %v379_v50 }
 0xa0a   :  { %v442_v18 = vpop.permute.xlu2 %441 }
 0xa0b   :  { %v444_v20 = vmul.f32 %v442_v18, %v436_v19 }
 0xa0d   :  { %446 = vrot.lane.b32.xlu0 %v444_v20, %s1572_s23 }
 0xa7f   :  { %v447_v22 = vpop.permute.xlu0 %446 }
 0xa80   :  { %v1712_v23 = vadd.f32 %v447_v22, %v439_v21 }
 0xa82   :  { %1429 = vtanh.f32 %v1712_v23 }
 0xa88   :  { %v1430_v24 = vpop.eup %1429 }
 0xa89   :  { %452 = vrot.lane.b32.xlu1 %v1430_v24, %s1572_s23  ;;  %v531_v24 = vld [vmem:[#allocation2 + $0xc] sm:$0x3] }
 0xafb   :  { %v453_v25 = vpop.permute.xlu1 %452 }
 0xafc   :  { %v455_v26 = vmul.f32 %v453_v25, %v436_v19 }
 0xafe   :  { %457 = vrot.lane.b32.xlu2 %v455_v26, %s1573_s3 }
 0xb58   :  { %v458_v31 = vpop.permute.xlu2 %457 }
 0xb59   :  { %460 = vst.msk [vmem:[#allocation3 + $0x8] sm:$0x3] %vm57_vm0, %v458_v31  ;;  %1357 = vmatmul.msk.f32.vlgmr.msrb.gmra.mxu3 %vm109_vm2, %v458_v31 }
 0xb5a   :  { %956 = vmatpush.msrb.mxu3 %v1720_v27 }
 0xb5c   :  { %957 = vmatpush.msrb.mxu3 %v1725_v28 }
 0xb5e   :  { %958 = vmatpush.msrb.mxu3 %v1732_v29 }
 0xb60   :  { %959 = vmatpush.msrb.mxu3 %v1741_v30 }
 0xb61   :  { %1365 = vmatmul.msk.f32.vlgmr.msra.gmra.mxu3 %vm109_vm2, %v719_v32  ;;  %v797_v32 = vld [vmem:[#allocation2 + $0x2] sm:$0x3] }
 0xb62   :  { %1236 = vmatpush.msra.mxu3 %v1720_v27 }
 0xb64   :  { %1237 = vmatpush.msra.mxu3 %v1725_v28 }
 0xb66   :  { %1238 = vmatpush.msra.mxu3 %v1732_v29 }
 0xb68   :  { %1239 = vmatpush.msra.mxu3 %v1741_v30 }
 0xbdc   :  { %v485_v34 = vpop.f32.mrf.mxu3 }
 0xbdd   :  { %v488_v35 = vadd.f32 %v485_v34, %v461_v33 }
 0xbdf   :  { %1431 = vtanh.f32 %v488_v35  ;;  %v1358_v42 = vmul.f32 -1.442695, %v488_v35 }
 0xbe4   :  { %v747_v37 = vpop.f32.mrf.mxu3 }
 0xbe5   :  { %v1432_v38 = vpop.eup %1431  ;;  %v750_v39 = vadd.f32 %v747_v37, %v722_v36 }
 0xbe6   :  { %511 = vrot.lane.b32.xlu0 %v1432_v38, %s1572_s23 }
 0xbe7   :  { %1433 = vtanh.f32 %v750_v39  ;;  %v1366_v43 = vmul.f32 -1.442695, %v750_v39 }
 0xbe8   :  { %1435 = vpow2.f32 %v1358_v42 }
 0xbe9   :  { %1437 = vpow2.f32 %v1366_v43 }
 0xbed   :  { %v1434_v41 = vpop.eup %1433 }
 0xbee   :  { %772 = vrot.lane.b32.xlu0 %v721_v40, %s1572_s23  ;;  %777 = vrot.lane.b32.xlu1 %v1434_v41, %s1572_s23  ;;  %v1436_v44 = vpop.eup %1435 }
 0xbef   :  { %v492_v45 = vadd.f32 1.0, %v1436_v44  ;;  %v1438_v46 = vpop.eup %1437 }
 0xbf0   :  { %v754_v47 = vadd.f32 1.0, %v1438_v46 }
 0xbf1   :  { %1439 = vrcp.f32 %v492_v45  ;;  %v504_v56 = vand.u32 2147483648, %v492_v45  ;;  %vm498_vm10 = vweird.f32 %v492_v45  ;;  %v502_v57 = vand.u32 2147483647, %v492_v45 }
 0xbf2   :  { %1441 = vrcp.f32 %v754_v47  ;;  %v766_v1 = vand.u32 2147483648, %v754_v47  ;;  %vm760_vm14 = vweird.f32 %v754_v47  ;;  %v764_v3 = vand.u32 2147483647, %v754_v47 }
 0xbf3   :  { %v505_v60 = vor.u32 1.1754944e-38, %v504_v56  ;;  %vm503_vm12 = vcmp.eq.f32.partialorder %v502_v57, 8.507059e+37 }
 0xbf4   :  { %v767_v4 = vor.u32 1.1754944e-38, %v766_v1  ;;  %vm765_vm3 = vcmp.eq.f32.partialorder %v764_v3, 8.507059e+37 }
 0xbf7   :  { %v1440_v48 = vpop.eup %1439 }
 0xbf8   :  { %v494_v49 = vmul.f32 %v1440_v48, %v492_v45  ;;  %v1442_v51 = vpop.eup %1441  ;;  %vm499_vm9 = vweird.f32 %v1440_v48 }
 0xbf9   :  { %v756_v53 = vmul.f32 %v1442_v51, %v754_v47  ;;  %vm500_vm11 = vmor %vm498_vm10, %vm499_vm9  ;;  %vm761_vm13 = vweird.f32 %v1442_v51 }
 0xbfa   :  { %v495_v50 = vsub.f32 1.0, %v494_v49  ;;  %vm762_vm15 = vmor %vm760_vm14, %vm761_vm13 }
 0xbfb   :  { %v757_v55 = vsub.f32 1.0, %v756_v53 }
 0xbfc   :  { %v496_v52 = vmul.f32 %v1440_v48, %v495_v50 }
 0xbfd   :  { %v758_v59 = vmul.f32 %v1442_v51, %v757_v55 }
 0xbfe   :  { %v497_v54 = vadd.f32 %v1440_v48, %v496_v52 }
 0xbff   :  { %v759_v0 = vadd.f32 %v1442_v51, %v758_v59 }
 0xc00   :  { %v501_v58 = vsel %vm500_vm11, %v1440_v48, %v497_v54 }
 0xc01   :  { %v506_v62 = vsel %vm503_vm12, %v505_v60, %v501_v58  ;;  %v763_v9 = vsel %vm762_vm15, %v1442_v51, %v759_v0 }
 0xc02   :  { %v768_v5 = vsel %vm765_vm3, %v767_v4, %v763_v9  ;;  %v509_v8 = vmul.f32 %v506_v62, %v1712_v23 }
 0xc58   :  { %v512_v61 = vpop.permute.xlu0 %511 }
 0xc59   :  { %v514_v63 = vmul.f32 %v512_v61, %v506_v62 }
 0xc5b   :  { %516 = vrot.lane.b32.xlu2 %v514_v63, %s1572_s23 }
 0xc60   :  { %v778_v6 = vpop.permute.xlu1 %777  ;;  %v773_v13 = vpop.permute.xlu0 %772 }
 0xc61   :  { %v780_v7 = vmul.f32 %v778_v6, %v768_v5  ;;  %v775_v14 = vmul.f32 %v773_v13, %v768_v5 }
 0xc63   :  { %782 = vrot.lane.b32.xlu1 %v780_v7, %s1572_s23 }
 0xcb5   :  { %v517_v10 = vpop.permute.xlu2 %516 }
 0xcb6   :  { %v1770_v11 = vadd.f32 %v517_v10, %v509_v8 }
 0xcb8   :  { %1443 = vtanh.f32 %v1770_v11 }
 0xcbe   :  { %v1444_v12 = vpop.eup %1443 }
 0xcbf   :  { %522 = vrot.lane.b32.xlu2 %v1444_v12, %s1572_s23 }
 0xcd5   :  { %v783_v15 = vpop.permute.xlu1 %782 }
 0xcd6   :  { %v1774_v16 = vadd.f32 %v783_v15, %v775_v14 }
 0xcd8   :  { %1445 = vtanh.f32 %v1774_v16 }
 0xcde   :  { %v1446_v17 = vpop.eup %1445 }
 0xcdf   :  { %788 = vrot.lane.b32.xlu0 %v1446_v17, %s1572_s23 }
 0xd19   :  { %v523_v18 = vpop.permute.xlu2 %522 }
 0xd1a   :  { %v525_v19 = vmul.f32 %v523_v18, %v506_v62  ;;  %v867_v18 = vld [vmem:[#allocation2 + $0x4] sm:$0x3] }
 0xd1c   :  { %527 = vrot.lane.b32.xlu1 %v525_v19, %s1573_s3 }
 0xd51   :  { %v789_v20 = vpop.permute.xlu0 %788 }
 0xd52   :  { %v791_v21 = vmul.f32 %v789_v20, %v768_v5 }
 0xd54   :  { %793 = vrot.lane.b32.xlu2 %v791_v21, %s1573_s3 }
 0xd8e   :  { %v528_v22 = vpop.permute.xlu1 %527 }
 0xd8f   :  { %530 = vst.msk [vmem:[#allocation3 + $0xa] sm:$0x3] %vm57_vm0, %v528_v22  ;;  %1359 = vmatmul.msk.f32.vlgmr.msrb.gmra.mxu0 %vm109_vm2, %v528_v22 }
 0xd90   :  { %1026 = vmatpush.msrb.mxu0 %v1720_v27 }
 0xd92   :  { %1027 = vmatpush.msrb.mxu0 %v1725_v28 }
 0xd94   :  { %1028 = vmatpush.msrb.mxu0 %v1732_v29 }
 0xd96   :  { %1029 = vmatpush.msrb.mxu0 %v1741_v30 }
 0xdae   :  { %v794_v23 = vpop.permute.xlu2 %793 }
 0xdaf   :  { %796 = vst.msk [vmem:[#allocation3] sm:$0x3] %vm57_vm0, %v794_v23  ;;  %1367 = vmatmul.msk.f32.vlgmr.msra.gmra.mxu0 %vm109_vm2, %v794_v23 }
 0xe0c   :  { %v555_v25 = vpop.f32.mrf.mxu0 }
 0xe0d   :  { %v558_v26 = vadd.f32 %v555_v25, %v531_v24 }
 0xe0f   :  { %1447 = vtanh.f32 %v558_v26  ;;  %v1360_v36 = vmul.f32 -1.442695, %v558_v26 }
 0xe15   :  { %v1448_v31 = vpop.eup %1447 }
 0xe16   :  { %581 = vrot.lane.b32.xlu0 %v1448_v31, %s1572_s23 }
 0xe2c   :  { %v821_v33 = vpop.f32.mrf.mxu0 }
 0xe2d   :  { %v824_v34 = vadd.f32 %v821_v33, %v797_v32 }
 0xe2f   :  { %1449 = vtanh.f32 %v824_v34  ;;  %v1368_v42 = vmul.f32 -1.442695, %v824_v34  ;;  %v601_v34 = vld [vmem:[#allocation2 + $0xe] sm:$0x3] }
 0xe30   :  { %1451 = vpow2.f32 %v1360_v36 }
 0xe35   :  { %v1450_v35 = vpop.eup %1449 }
 0xe36   :  { %847 = vrot.lane.b32.xlu1 %v1450_v35, %s1572_s23  ;;  %v1452_v37 = vpop.eup %1451 }
 0xe37   :  { %v562_v38 = vadd.f32 1.0, %v1452_v37 }
 0xe39   :  { %1453 = vrcp.f32 %v562_v38  ;;  %v574_v45 = vand.u32 2147483648, %v562_v38  ;;  %vm568_vm5 = vweird.f32 %v562_v38  ;;  %v572_v46 = vand.u32 2147483647, %v562_v38 }
 0xe3a   :  { %1455 = vpow2.f32 %v1368_v42 }
 0xe3b   :  { %v575_v49 = vor.u32 1.1754944e-38, %v574_v45  ;;  %vm573_vm6 = vcmp.eq.f32.partialorder %v572_v46, 8.507059e+37 }
 0xe3f   :  { %v1454_v39 = vpop.eup %1453 }
 0xe40   :  { %v564_v40 = vmul.f32 %v1454_v39, %v562_v38  ;;  %vm569_vm4 = vweird.f32 %v1454_v39  ;;  %v1456_v47 = vpop.eup %1455 }
 0xe41   :  { %vm570_vm1 = vmor %vm568_vm5, %vm569_vm4  ;;  %v828_v50 = vadd.f32 1.0, %v1456_v47 }
 0xe42   :  { %v565_v41 = vsub.f32 1.0, %v564_v40 }
 0xe43   :  { %1457 = vrcp.f32 %v828_v50  ;;  %v840_v59 = vand.u32 2147483648, %v828_v50  ;;  %vm834_vm8 = vweird.f32 %v828_v50  ;;  %v838_v60 = vand.u32 2147483647, %v828_v50 }
 0xe44   :  { %v566_v43 = vmul.f32 %v1454_v39, %v565_v41 }
 0xe45   :  { %v841_v62 = vor.u32 1.1754944e-38, %v840_v59  ;;  %vm839_vm10 = vcmp.eq.f32.partialorder %v838_v60, 8.507059e+37 }
 0xe46   :  { %v567_v44 = vadd.f32 %v1454_v39, %v566_v43 }
 0xe48   :  { %v571_v48 = vsel %vm570_vm1, %v1454_v39, %v567_v44 }
 0xe49   :  { %v576_v51 = vsel %vm573_vm6, %v575_v49, %v571_v48  ;;  %v1458_v54 = vpop.eup %1457 }
 0xe4a   :  { %v830_v55 = vmul.f32 %v1458_v54, %v828_v50  ;;  %vm835_vm7 = vweird.f32 %v1458_v54  ;;  %v579_v3 = vmul.f32 %v576_v51, %v1770_v11 }
 0xe4b   :  { %vm836_vm9 = vmor %vm834_vm8, %vm835_vm7 }
 0xe4c   :  { %v831_v56 = vsub.f32 1.0, %v830_v55 }
 0xe4e   :  { %v832_v57 = vmul.f32 %v1458_v54, %v831_v56 }
 0xe50   :  { %v833_v58 = vadd.f32 %v1458_v54, %v832_v57 }
 0xe52   :  { %v837_v61 = vsel %vm836_vm9, %v1458_v54, %v833_v58 }
 0xe53   :  { %v842_v0 = vsel %vm839_vm10, %v841_v62, %v837_v61  ;;  %v937_v62 = vld [vmem:[#allocation2 + $0x6] sm:$0x3] }
 0xe54   :  { %v845_v6 = vmul.f32 %v842_v0, %v1774_v16 }
 0xe88   :  { %v582_v52 = vpop.permute.xlu0 %581 }
 0xe89   :  { %v584_v53 = vmul.f32 %v582_v52, %v576_v51 }
 0xe8b   :  { %586 = vrot.lane.b32.xlu2 %v584_v53, %s1572_s23 }
 0xea8   :  { %v848_v63 = vpop.permute.xlu1 %847 }
 0xea9   :  { %v850_v1 = vmul.f32 %v848_v63, %v842_v0 }
 0xeab   :  { %852 = vrot.lane.b32.xlu0 %v850_v1, %s1572_s23 }
 0xee5   :  { %v587_v9 = vpop.permute.xlu2 %586 }
 0xee6   :  { %v1793_v4 = vadd.f32 %v587_v9, %v579_v3 }
 0xee8   :  { %1459 = vtanh.f32 %v1793_v4 }
 0xeee   :  { %v1460_v5 = vpop.eup %1459 }
 0xeef   :  { %592 = vrot.lane.b32.xlu1 %v1460_v5, %s1572_s23 }
 0xf1d   :  { %v853_v7 = vpop.permute.xlu0 %852 }
 0xf1e   :  { %v855_v8 = vadd.f32 %v853_v7, %v845_v6 }
 0xf20   :  { %1461 = vtanh.f32 %v855_v8 }
 0xf26   :  { %v1462_v10 = vpop.eup %1461 }
 0xf27   :  { %858 = vrot.lane.b32.xlu2 %v1462_v10, %s1572_s23 }
 0xf61   :  { %v593_v12 = vpop.permute.xlu1 %592 }
 0xf62   :  { %v595_v13 = vmul.f32 %v593_v12, %v576_v51 }
 0xf64   :  { %597 = vrot.lane.b32.xlu0 %v595_v13, %s1573_s3 }
 0xf81   :  { %v859_v11 = vpop.permute.xlu2 %858 }
 0xf82   :  { %v861_v14 = vmul.f32 %v859_v11, %v842_v0 }
 0xf84   :  { %863 = vrot.lane.b32.xlu1 %v861_v14, %s1573_s3 }
 0xfd6   :  { %v598_v15 = vpop.permute.xlu0 %597 }
 0xfd7   :  { %600 = vst.msk [vmem:[#allocation3 + $0xc] sm:$0x3] %vm57_vm0, %v598_v15  ;;  %1361 = vmatmul.msk.f32.vlgmr.msra.gmra.mxu1 %vm109_vm2, %v598_v15 }
 0xfd8   :  { %1096 = vmatpush.msra.mxu1 %v1720_v27 }
 0xfda   :  { %1097 = vmatpush.msra.mxu1 %v1725_v28 }
 0xfdc   :  { %1098 = vmatpush.msra.mxu1 %v1732_v29 }
 0xfde   :  { %1099 = vmatpush.msra.mxu1 %v1741_v30 }
 0xff6   :  { %v864_v16 = vpop.permute.xlu1 %863 }
 0xff7   :  { %866 = vst.msk [vmem:[#allocation3 + $0x2] sm:$0x3] %vm57_vm0, %v864_v16  ;;  %1369 = vmatmul.msk.f32.vlgmr.msrb.gmra.mxu1 %vm109_vm2, %v864_v16 }
0x1054   :  { %v625_v17 = vpop.f32.mrf.mxu1 }
0x1055   :  { %v628_v35 = vadd.f32 %v625_v17, %v601_v34 }
0x1057   :  { %v1362_v44 = vmul.f32 -1.442695, %v628_v35 }
0x1074   :  { %v891_v19 = vpop.f32.mrf.mxu1 }
0x1075   :  { %v894_v20 = vadd.f32 %v891_v19, %v867_v18 }
0x1077   :  { %1463 = vtanh.f32 %v894_v20  ;;  %v1370_v27 = vmul.f32 -1.442695, %v894_v20 }
0x1079   :  { %1465 = vpow2.f32 %v1370_v27 }
0x107d   :  { %v1464_v21 = vpop.eup %1463 }
0x107e   :  { %917 = vrot.lane.b32.xlu2 %v1464_v21, %s1572_s23 }
0x107f   :  { %v1466_v28 = vpop.eup %1465 }
0x1080   :  { %v898_v22 = vadd.f32 1.0, %v1466_v28 }
0x1082   :  { %1467 = vrcp.f32 %v898_v22  ;;  %v910_v26 = vand.u32 2147483648, %v898_v22  ;;  %vm904_vm12 = vweird.f32 %v898_v22  ;;  %v908_v31 = vand.u32 2147483647, %v898_v22 }
0x1083   :  { %1469 = vtanh.f32 %v628_v35 }
0x1084   :  { %v911_v33 = vor.u32 1.1754944e-38, %v910_v26  ;;  %vm909_vm14 = vcmp.eq.f32.partialorder %v908_v31, 8.507059e+37 }
0x1088   :  { %v1468_v29 = vpop.eup %1467 }
0x1089   :  { %v900_v30 = vmul.f32 %v1468_v29, %v898_v22  ;;  %vm905_vm11 = vweird.f32 %v1468_v29  ;;  %v1470_v39 = vpop.eup %1469 }
0x108a   :  { %vm906_vm13 = vmor %vm904_vm12, %vm905_vm11 }
0x108b   :  { %v901_v23 = vsub.f32 1.0, %v900_v30 }
0x108d   :  { %v902_v24 = vmul.f32 %v1468_v29, %v901_v23 }
0x108f   :  { %v903_v25 = vadd.f32 %v1468_v29, %v902_v24 }
0x1091   :  { %v907_v32 = vsel %vm906_vm13, %v1468_v29, %v903_v25 }
0x1092   :  { %v912_v37 = vsel %vm909_vm14, %v911_v33, %v907_v32 }
0x1093   :  { %v915_v40 = vmul.f32 %v912_v37, %v855_v8 }
0x10d8   :  { %v918_v36 = vpop.permute.xlu2 %917 }
0x10d9   :  { %v920_v38 = vmul.f32 %v918_v36, %v912_v37 }
0x10db   :  { %922 = vrot.lane.b32.xlu0 %v920_v38, %s1572_s23 }
0x10e3   :  { %651 = vrot.lane.b32.xlu0 %v1470_v39, %s1572_s23 }
0x114d   :  { %v923_v41 = vpop.permute.xlu0 %922 }
0x114e   :  { %v1812_v42 = vadd.f32 %v923_v41, %v915_v40 }
0x1150   :  { %1471 = vtanh.f32 %v1812_v42 }
0x1151   :  { %1473 = vpow2.f32 %v1362_v44 }
0x1155   :  { %v652_v57 = vpop.permute.xlu0 %651 }
0x1156   :  { %v1472_v43 = vpop.eup %1471 }
0x1157   :  { %928 = vrot.lane.b32.xlu1 %v1472_v43, %s1572_s23  ;;  %v1474_v45 = vpop.eup %1473 }
0x1158   :  { %v632_v46 = vadd.f32 1.0, %v1474_v45 }
0x115a   :  { %1475 = vrcp.f32 %v632_v46  ;;  %v644_v54 = vand.u32 2147483648, %v632_v46  ;;  %vm638_vm3 = vweird.f32 %v632_v46  ;;  %v642_v55 = vand.u32 2147483647, %v632_v46 }
0x115c   :  { %v645_v58 = vor.u32 1.1754944e-38, %v644_v54  ;;  %vm643_vm5 = vcmp.eq.f32.partialorder %v642_v55, 8.507059e+37 }
0x1160   :  { %v1476_v47 = vpop.eup %1475 }
0x1161   :  { %v634_v48 = vmul.f32 %v1476_v47, %v632_v46  ;;  %vm639_vm15 = vweird.f32 %v1476_v47 }
0x1162   :  { %vm640_vm4 = vmor %vm638_vm3, %vm639_vm15 }
0x1163   :  { %v635_v49 = vsub.f32 1.0, %v634_v48 }
0x1165   :  { %v636_v50 = vmul.f32 %v1476_v47, %v635_v49 }
0x1167   :  { %v637_v52 = vadd.f32 %v1476_v47, %v636_v50 }
0x1169   :  { %v641_v56 = vsel %vm640_vm4, %v1476_v47, %v637_v52 }
0x116a   :  { %v646_v59 = vsel %vm643_vm5, %v645_v58, %v641_v56 }
0x116b   :  { %v654_v60 = vmul.f32 %v652_v57, %v646_v59  ;;  %v649_v3 = vmul.f32 %v646_v59, %v1793_v4 }
0x11c9   :  { %v929_v51 = vpop.permute.xlu1 %928 }
0x11ca   :  { %v931_v53 = vmul.f32 %v929_v51, %v912_v37 }
0x11cc   :  { %933 = vrot.lane.b32.xlu2 %v931_v53, %s1573_s3 }
0x11d4   :  { %656 = vrot.lane.b32.xlu2 %v654_v60, %s1572_s23 }
0x1226   :  { %v934_v61 = vpop.permute.xlu2 %933 }
0x1227   :  { %936 = vst.msk [vmem:[#allocation3 + $0x4] sm:$0x3] %vm57_vm0, %v934_v61  ;;  %1371 = vmatmul.msk.f32.vlgmr.msrb.gmra.mxu3 %vm109_vm2, %v934_v61 }
0x122e   :  { %v657_v1 = vpop.permute.xlu2 %656 }
0x122f   :  { %v1821_v9 = vadd.f32 %v657_v1, %v649_v3 }
0x12aa   :  { %v961_v63 = vpop.f32.mrf.mxu3 }
0x12ab   :  { %v964_v0 = vadd.f32 %v961_v63, %v937_v62 }
0x12ad   :  { %1477 = vtanh.f32 %v964_v0  ;;  %v1372_v7 = vmul.f32 -1.442695, %v964_v0 }
0x12ae   :  { %1479 = vtanh.f32 %v1821_v9 }
0x12af   :  { %1481 = vpow2.f32 %v1372_v7 }
0x12b3   :  { %v1478_v5 = vpop.eup %1477 }
0x12b4   :  { %987 = vrot.lane.b32.xlu1 %v1478_v5, %s1572_s23  ;;  %v1480_v6 = vpop.eup %1479 }
0x12b5   :  { %v1482_v8 = vpop.eup %1481 }
0x12b6   :  { %v968_v10 = vadd.f32 1.0, %v1482_v8 }
0x12b8   :  { %1483 = vrcp.f32 %v968_v10  ;;  %v980_v15 = vand.u32 2147483648, %v968_v10  ;;  %vm974_vm6 = vweird.f32 %v968_v10  ;;  %v978_v16 = vand.u32 2147483647, %v968_v10 }
0x12ba   :  { %v981_v18 = vor.u32 1.1754944e-38, %v980_v15  ;;  %vm979_vm8 = vcmp.eq.f32.partialorder %v978_v16, 8.507059e+37 }
0x12bc   :  { %662 = vrot.lane.b32.xlu1 %v1480_v6, %s1572_s23 }
0x12be   :  { %v1484_v12 = vpop.eup %1483 }
0x12bf   :  { %v970_v13 = vmul.f32 %v1484_v12, %v968_v10  ;;  %vm975_vm1 = vweird.f32 %v1484_v12 }
0x12c0   :  { %vm976_vm7 = vmor %vm974_vm6, %vm975_vm1 }
0x12c1   :  { %v971_v11 = vsub.f32 1.0, %v970_v13 }
0x12c3   :  { %v972_v14 = vmul.f32 %v1484_v12, %v971_v11 }
0x12c5   :  { %v973_v4 = vadd.f32 %v1484_v12, %v972_v14 }
0x12c7   :  { %v977_v17 = vsel %vm976_vm7, %v1484_v12, %v973_v4 }
0x12c8   :  { %v982_v20 = vsel %vm979_vm8, %v981_v18, %v977_v17 }
0x12c9   :  { %v985_v22 = vmul.f32 %v982_v20, %v1812_v42 }
0x1326   :  { %v988_v19 = vpop.permute.xlu1 %987 }
0x1327   :  { %v990_v21 = vmul.f32 %v988_v19, %v982_v20 }
0x1329   :  { %992 = vrot.lane.b32.xlu0 %v990_v21, %s1572_s23 }
0x132e   :  { %v663_v27 = vpop.permute.xlu1 %662 }
0x132f   :  { %v665_v28 = vmul.f32 %v663_v27, %v646_v59 }
0x1331   :  { %667 = vrot.lane.b32.xlu0 %v665_v28, %s1573_s3 }
0x139b   :  { %v993_v29 = vpop.permute.xlu0 %992 }
0x139c   :  { %v995_v30 = vadd.f32 %v993_v29, %v985_v22 }
0x139e   :  { %1485 = vtanh.f32 %v995_v30 }
0x13a3   :  { %v668_v23 = vpop.permute.xlu0 %667 }
0x13a4   :  { %v1486_v24 = vpop.eup %1485  ;;  %670 = vst.msk [vmem:[#allocation3 + $0xe] sm:$0x3] %vm57_vm0, %v668_v23 }
0x13a5   :  { %671 = vst.msk [vmem:[#allocation4] sm:$0x3] %vm57_vm0, %v668_v23  ;;  %998 = vrot.lane.b32.xlu2 %v1486_v24, %s1572_s23 }
0x13ab   :  { %v678_v25 = vld [vmem:[#allocation3 + $0x8] sm:$0xff] }
0x13ac   :  { %1364 = vmatmul.msk.f32.gmra.mxu2 %vm109_vm2, %v678_v25 }
0x13ff   :  { %v999_v26 = vpop.permute.xlu2 %998 }
0x1400   :  { %v1001_v31 = vmul.f32 %v999_v26, %v982_v20 }
0x1402   :  { %1003 = vrot.lane.b32.xlu1 %v1001_v31, %s1573_s3 }
0x142f   :  { %v713_v32 = vpop.f32.mrf.mxu2 }
0x1430   :  { %v714_v33 = vadd.f32 %v1707_v2, %v713_v32 }
0x1432   :  { %717 = vst [vmem:[#allocation2 + $0x8] sm:$0xff] %v714_v33 }
0x1439   :  { %v1007_v35 = vld [vmem:[#allocation2 + $0x8] sm:$0x3]  ;;  %v1077_v60 = vld [vmem:[#allocation2 + $0xa] sm:$0x3]  ;;  %v1147_v22 = vld [vmem:[#allocation2 + $0xc] sm:$0x3] }
0x1474   :  { %v1004_v34 = vpop.permute.xlu1 %1003 }
0x1475   :  { %1006 = vst.msk [vmem:[#allocation3 + $0x6] sm:$0x3] %vm57_vm0, %v1004_v34  ;;  %1373 = vmatmul.msk.f32.vlgmr.msrb.gmra.mxu0 %vm109_vm2, %v1004_v34 }
0x14f2   :  { %v1031_v36 = vpop.f32.mrf.mxu0 }
0x14f3   :  { %v1034_v37 = vadd.f32 %v1031_v36, %v1007_v35 }
0x14f5   :  { %1487 = vtanh.f32 %v1034_v37  ;;  %v1374_v39 = vmul.f32 -1.442695, %v1034_v37 }
0x14f7   :  { %1489 = vpow2.f32 %v1374_v39 }
0x14fb   :  { %v1488_v38 = vpop.eup %1487 }
0x14fc   :  { %1057 = vrot.lane.b32.xlu2 %v1488_v38, %s1572_s23 }
0x14fd   :  { %v1490_v40 = vpop.eup %1489 }
0x14fe   :  { %v1038_v41 = vadd.f32 1.0, %v1490_v40 }
0x1500   :  { %1491 = vrcp.f32 %v1038_v41  ;;  %v1050_v46 = vand.u32 2147483648, %v1038_v41  ;;  %vm1044_vm10 = vweird.f32 %v1038_v41  ;;  %v1048_v47 = vand.u32 2147483647, %v1038_v41 }
0x1502   :  { %v1051_v49 = vor.u32 1.1754944e-38, %v1050_v46  ;;  %vm1049_vm12 = vcmp.eq.f32.partialorder %v1048_v47, 8.507059e+37 }
0x1506   :  { %v1492_v42 = vpop.eup %1491 }
0x1507   :  { %v1040_v2 = vmul.f32 %v1492_v42, %v1038_v41  ;;  %vm1045_vm9 = vweird.f32 %v1492_v42 }
0x1508   :  { %vm1046_vm11 = vmor %vm1044_vm10, %vm1045_vm9 }
0x1509   :  { %v1041_v43 = vsub.f32 1.0, %v1040_v2 }
0x150b   :  { %v1042_v44 = vmul.f32 %v1492_v42, %v1041_v43 }
0x150d   :  { %v1043_v45 = vadd.f32 %v1492_v42, %v1042_v44 }
0x150f   :  { %v1047_v48 = vsel %vm1046_vm11, %v1492_v42, %v1043_v45 }
0x1510   :  { %v1052_v51 = vsel %vm1049_vm12, %v1051_v49, %v1047_v48  ;;  %v1217_v49 = vld [vmem:[#allocation2 + $0xe] sm:$0x3] }
0x1511   :  { %v1055_v53 = vmul.f32 %v1052_v51, %v995_v30 }
0x1556   :  { %v1058_v50 = vpop.permute.xlu2 %1057 }
0x1557   :  { %v1060_v52 = vmul.f32 %v1058_v50, %v1052_v51 }
0x1559   :  { %1062 = vrot.lane.b32.xlu0 %v1060_v52, %s1572_s23 }
0x15cb   :  { %v1063_v54 = vpop.permute.xlu0 %1062 }
0x15cc   :  { %v1065_v55 = vadd.f32 %v1063_v54, %v1055_v53 }
0x15ce   :  { %1493 = vtanh.f32 %v1065_v55 }
0x15d4   :  { %v1494_v56 = vpop.eup %1493 }
0x15d5   :  { %1068 = vrot.lane.b32.xlu1 %v1494_v56, %s1572_s23 }
0x1647   :  { %v1069_v57 = vpop.permute.xlu1 %1068 }
0x1648   :  { %v1071_v58 = vmul.f32 %v1069_v57, %v1052_v51 }
0x164a   :  { %1073 = vrot.lane.b32.xlu2 %v1071_v58, %s1573_s3 }
0x16a4   :  { %v1074_v59 = vpop.permute.xlu2 %1073 }
0x16a5   :  { %1076 = vst.msk [vmem:[#allocation3 + $0x8] sm:$0x3] %vm57_vm0, %v1074_v59  ;;  %1375 = vmatmul.msk.f32.vlgmr.msra.gmra.mxu1 %vm109_vm2, %v1074_v59 }
0x1722   :  { %v1101_v61 = vpop.f32.mrf.mxu1 }
0x1723   :  { %v1104_v62 = vadd.f32 %v1101_v61, %v1077_v60 }
0x1725   :  { %1495 = vtanh.f32 %v1104_v62  ;;  %v1376_v0 = vmul.f32 -1.442695, %v1104_v62 }
0x1727   :  { %1497 = vpow2.f32 %v1376_v0 }
0x172b   :  { %v1496_v63 = vpop.eup %1495 }
0x172c   :  { %1127 = vrot.lane.b32.xlu0 %v1496_v63, %s1572_s23 }
0x172d   :  { %v1498_v1 = vpop.eup %1497 }
0x172e   :  { %v1108_v3 = vadd.f32 1.0, %v1498_v1 }
0x1730   :  { %1499 = vrcp.f32 %v1108_v3  ;;  %v1120_v12 = vand.u32 2147483648, %v1108_v3  ;;  %vm1114_vm14 = vweird.f32 %v1108_v3  ;;  %v1118_v13 = vand.u32 2147483647, %v1108_v3 }
0x1732   :  { %v1121_v14 = vor.u32 1.1754944e-38, %v1120_v12  ;;  %vm1119_vm3 = vcmp.eq.f32.partialorder %v1118_v13, 8.507059e+37 }
0x1736   :  { %v1500_v5 = vpop.eup %1499 }
0x1737   :  { %v1110_v6 = vmul.f32 %v1500_v5, %v1108_v3  ;;  %vm1115_vm13 = vweird.f32 %v1500_v5 }
0x1738   :  { %vm1116_vm15 = vmor %vm1114_vm14, %vm1115_vm13 }
0x1739   :  { %v1111_v7 = vsub.f32 1.0, %v1110_v6 }
0x173b   :  { %v1112_v8 = vmul.f32 %v1500_v5, %v1111_v7 }
0x173d   :  { %v1113_v10 = vadd.f32 %v1500_v5, %v1112_v8 }
0x173f   :  { %v1117_v11 = vsel %vm1116_vm15, %v1500_v5, %v1113_v10 }
0x1740   :  { %v1122_v15 = vsel %vm1119_vm3, %v1121_v14, %v1117_v11 }
0x1741   :  { %v1125_v17 = vmul.f32 %v1122_v15, %v1065_v55 }
0x179e   :  { %v1128_v4 = vpop.permute.xlu0 %1127 }
0x179f   :  { %v1130_v16 = vmul.f32 %v1128_v4, %v1122_v15 }
0x17a1   :  { %1132 = vrot.lane.b32.xlu1 %v1130_v16, %s1572_s23 }
0x1813   :  { %v1133_v18 = vpop.permute.xlu1 %1132 }
0x1814   :  { %v1135_v19 = vadd.f32 %v1133_v18, %v1125_v17 }
0x1816   :  { %1501 = vtanh.f32 %v1135_v19 }
0x181c   :  { %v1502_v20 = vpop.eup %1501 }
0x181d   :  { %1138 = vrot.lane.b32.xlu2 %v1502_v20, %s1572_s23 }
0x1877   :  { %v1139_v21 = vpop.permute.xlu2 %1138 }
0x1878   :  { %v1141_v27 = vmul.f32 %v1139_v21, %v1122_v15 }
0x187a   :  { %1143 = vrot.lane.b32.xlu0 %v1141_v27, %s1573_s3 }
0x18ec   :  { %v1144_v28 = vpop.permute.xlu0 %1143 }
0x18ed   :  { %1146 = vst.msk [vmem:[#allocation3 + $0xa] sm:$0x3] %vm57_vm0, %v1144_v28  ;;  %1377 = vmatmul.msk.f32.vlgmr.msrb.gmra.mxu2 %vm109_vm2, %v1144_v28 }
0x1970   :  { %v1171_v29 = vpop.f32.mrf.mxu2 }
0x1971   :  { %v1174_v30 = vadd.f32 %v1171_v29, %v1147_v22 }
0x1973   :  { %1503 = vtanh.f32 %v1174_v30  ;;  %v1378_v24 = vmul.f32 -1.442695, %v1174_v30 }
0x1975   :  { %1505 = vpow2.f32 %v1378_v24 }
0x1979   :  { %v1504_v23 = vpop.eup %1503 }
0x197a   :  { %1197 = vrot.lane.b32.xlu1 %v1504_v23, %s1572_s23 }
0x197b   :  { %v1506_v25 = vpop.eup %1505 }
0x197c   :  { %v1178_v26 = vadd.f32 1.0, %v1506_v25 }
0x197e   :  { %1507 = vrcp.f32 %v1178_v26  ;;  %v1190_v36 = vand.u32 2147483648, %v1178_v26  ;;  %vm1184_vm5 = vweird.f32 %v1178_v26  ;;  %v1188_v37 = vand.u32 2147483647, %v1178_v26 }
0x1980   :  { %v1191_v39 = vor.u32 1.1754944e-38, %v1190_v36  ;;  %vm1189_vm6 = vcmp.eq.f32.partialorder %v1188_v37, 8.507059e+37 }
0x1984   :  { %v1508_v31 = vpop.eup %1507 }
0x1985   :  { %v1180_v32 = vmul.f32 %v1508_v31, %v1178_v26  ;;  %vm1185_vm4 = vweird.f32 %v1508_v31 }
0x1986   :  { %vm1186_vm1 = vmor %vm1184_vm5, %vm1185_vm4 }
0x1987   :  { %v1181_v33 = vsub.f32 1.0, %v1180_v32 }
0x1989   :  { %v1182_v34 = vmul.f32 %v1508_v31, %v1181_v33 }
0x198b   :  { %v1183_v35 = vadd.f32 %v1508_v31, %v1182_v34 }
0x198d   :  { %v1187_v38 = vsel %vm1186_vm1, %v1508_v31, %v1183_v35 }
0x198e   :  { %v1192_v41 = vsel %vm1189_vm6, %v1191_v39, %v1187_v38 }
0x198f   :  { %v1195_v2 = vmul.f32 %v1192_v41, %v1135_v19 }
0x19ec   :  { %v1198_v40 = vpop.permute.xlu1 %1197 }
0x19ed   :  { %v1200_v42 = vmul.f32 %v1198_v40, %v1192_v41 }
0x19ef   :  { %1202 = vrot.lane.b32.xlu2 %v1200_v42, %s1572_s23 }
0x1a49   :  { %v1203_v43 = vpop.permute.xlu2 %1202 }
0x1a4a   :  { %v1205_v44 = vadd.f32 %v1203_v43, %v1195_v2 }
0x1a4c   :  { %1509 = vtanh.f32 %v1205_v44 }
0x1a52   :  { %v1510_v45 = vpop.eup %1509 }
0x1a53   :  { %1208 = vrot.lane.b32.xlu0 %v1510_v45, %s1572_s23 }
0x1ac5   :  { %v1209_v46 = vpop.permute.xlu0 %1208 }
0x1ac6   :  { %v1211_v47 = vmul.f32 %v1209_v46, %v1192_v41 }
0x1ac8   :  { %1213 = vrot.lane.b32.xlu1 %v1211_v47, %s1573_s3 }
0x1b3a   :  { %v1214_v48 = vpop.permute.xlu1 %1213 }
0x1b3b   :  { %1216 = vst.msk [vmem:[#allocation3 + $0xc] sm:$0x3] %vm57_vm0, %v1214_v48  ;;  %1379 = vmatmul.msk.f32.vlgmr.msra.gmra.mxu3 %vm109_vm2, %v1214_v48 }
0x1bbe   :  { %v1241_v50 = vpop.f32.mrf.mxu3 }
0x1bbf   :  { %v1244_v51 = vadd.f32 %v1241_v50, %v1217_v49 }
0x1bc1   :  { %1511 = vtanh.f32 %v1244_v51  ;;  %v1380_v53 = vmul.f32 -1.442695, %v1244_v51 }
0x1bc3   :  { %1513 = vpow2.f32 %v1380_v53 }
0x1bc7   :  { %v1512_v52 = vpop.eup %1511 }
0x1bc8   :  { %1267 = vrot.lane.b32.xlu2 %v1512_v52, %s1572_s23 }
0x1bc9   :  { %v1514_v54 = vpop.eup %1513 }
0x1bca   :  { %v1248_v55 = vadd.f32 1.0, %v1514_v54 }
0x1bcc   :  { %1515 = vrcp.f32 %v1248_v55  ;;  %v1260_v61 = vand.u32 2147483648, %v1248_v55  ;;  %vm1254_vm8 = vweird.f32 %v1248_v55  ;;  %v1258_v62 = vand.u32 2147483647, %v1248_v55 }
0x1bce   :  { %v1261_v0 = vor.u32 1.1754944e-38, %v1260_v61  ;;  %vm1259_vm10 = vcmp.eq.f32.partialorder %v1258_v62, 8.507059e+37 }
0x1bd2   :  { %v1516_v56 = vpop.eup %1515 }
0x1bd3   :  { %v1250_v57 = vmul.f32 %v1516_v56, %v1248_v55  ;;  %vm1255_vm7 = vweird.f32 %v1516_v56 }
0x1bd4   :  { %vm1256_vm9 = vmor %vm1254_vm8, %vm1255_vm7 }
0x1bd5   :  { %v1251_v58 = vsub.f32 1.0, %v1250_v57 }
0x1bd7   :  { %v1252_v59 = vmul.f32 %v1516_v56, %v1251_v58 }
0x1bd9   :  { %v1253_v60 = vadd.f32 %v1516_v56, %v1252_v59 }
0x1bdb   :  { %v1257_v63 = vsel %vm1256_vm9, %v1516_v56, %v1253_v60 }
0x1bdc   :  { %v1262_v3 = vsel %vm1259_vm10, %v1261_v0, %v1257_v63 }
0x1bdd   :  { %v1265_v6 = vmul.f32 %v1262_v3, %v1205_v44 }
0x1c22   :  { %v1268_v1 = vpop.permute.xlu2 %1267 }
0x1c23   :  { %v1270_v5 = vmul.f32 %v1268_v1, %v1262_v3 }
0x1c25   :  { %1272 = vrot.lane.b32.xlu0 %v1270_v5, %s1572_s23 }
0x1c2d   :  { %673 = vrot.lane.b32.xlu0 %v1821_v9, %s1574_s5 }
0x1c97   :  { %v1273_v7 = vpop.permute.xlu0 %1272 }
0x1c98   :  { %v1275_v8 = vadd.f32 %v1273_v7, %v1265_v6 }
0x1c9a   :  { %1517 = vtanh.f32 %v1275_v8 }
0x1c9f   :  { %v674_v10 = vpop.permute.xlu0 %673 }
0x1ca0   :  { %v1518_v12 = vpop.eup %1517  ;;  %676 = vst.msk [vmem:[#allocation6] sm:$0x3] %vm57_vm0, %v674_v10 }
0x1ca1   :  { %1278 = vrot.lane.b32.xlu1 %v1518_v12, %s1572_s23 }
0x1ca9   :  { %1289 = vrot.lane.b32.xlu1 %v1275_v8, %s1574_s5 }
0x1d13   :  { %v1279_v13 = vpop.permute.xlu1 %1278 }
0x1d14   :  { %v1281_v11 = vmul.f32 %v1279_v13, %v1262_v3 }
0x1d16   :  { %1283 = vrot.lane.b32.xlu2 %v1281_v11, %s1573_s3  ;;  %s1307_s3 = sshll.u32 %s1890_s8, 4  ;;  %s1308_s3 = int_to_ptr.hbm [resolvable:$true] %s1307_s3 }
0x1d1b   :  { %v1290_v9 = vpop.permute.xlu1 %1289 }
0x1d1c   :  { %1292 = vst.msk [vmem:[#allocation6 + $0x2] sm:$0x3] %vm57_vm0, %v1290_v9 }
0x1d1d   :  { %1326 = dma.vmem_to_hbm [thread:$0]  %s1319_s20, 64, %s1321_s22, [#allocation7], %s1572_s23, %s1572_s23, %s1576_s24  }
0x1d70   :  { %v1284_v14 = vpop.permute.xlu2 %1283 }
0x1d71   :  { %1286 = vst.msk [vmem:[#allocation3 + $0xe] sm:$0x3] %vm57_vm0, %v1284_v14 }
0x1d72   :  { %1287 = vst.msk [vmem:[#allocation4 + $0x2] sm:$0x3] %vm57_vm0, %v1284_v14 }
0x1d73   :  { %1313 = dma.vmem_to_hbm [thread:$0]  %s1306_s26, 64, %s1308_s3, [#allocation5], %s1572_s23, %s1572_s23, %s1576_s24  }
0x1d78   :  { %v1293_v4 = vld [vmem:[#allocation3] ss:$2 sm:$0xff]  ;;  %v1296_v15 = vld [vmem:[#allocation3 + $0x1] ss:$2 sm:$0xff] }
0x1d79   :  { %1294 = vst.msk [vmem:[%s1889_s7] sm:$0xff] %vm109_vm2, %v1293_v4 }
0x1d7a   :  { %1381 = vst.msk [vmem:[%s1889_s7 + $0x8] sm:$0xff] %vm109_vm2, %v1296_v15 }
0x1d7b   :  { %1567 = dma.done.wait [#allocation5], 64  }
0x1d7c   :  { %1568 = vsyncadd [#allocation5], 4294967232 }
0x1d7d   :  { %1569 = dma.done.wait [#allocation7], 64  }
0x1d7e   :  { %1570 = vsyncadd [#allocation7], 4294967232 }
0x1d7f   :  { %1337 = vsyncpa [#allocation5], 1 }
0x1d80   :  { %1338 = vsyncpa [#allocation7], 1 }

</bundles_post_ra>
